<compile_context>
chip_gen: v7x
topology: tpu7x:2x2x1
jax: 0.10.0
libtpu: 0.0.40
codegen_flags: <defaults>
</compile_context>

<pallas_src>
import functools
import math

import jax
import jax.numpy as jnp
from jax.experimental import pallas as pl
from jax.experimental.pallas import tpu as pltpu


def _cdiv(a, b):
    return -(-a // b)


def _round_up(a, b):
    return _cdiv(a, b) * b


def _apply_act(y, name):
    if name == "relu":
        return jnp.maximum(y, 0.0)
    if name == "tanh":
        return jnp.tanh(y)
    raise ValueError(f"unsupported activation: {name!r}")


def _mm(x, w_ref, b_ref=None):
    """Matmul with bf16 operands and f32 accumulation (+ optional bias)."""
    y = jnp.dot(x.astype(jnp.bfloat16), w_ref[...].astype(jnp.bfloat16),
                preferred_element_type=jnp.float32)
    if b_ref is not None:
        y = y + b_ref[...]
    return y


# ----------------------------------------------------------------------------
# Single fused kernel: pre-MLP -> QKV -> windowed attention -> post-MLP
# ----------------------------------------------------------------------------
def _fused_kernel(*refs, n_pre, n_post, A, S, TS, H, inv_sqrt_h,
                  acts_pre, acts_post):
    Wn = 2 * A + 1
    idx = 0
    x_cur_ref = refs[idx]; idx += 1
    x_nxt_ref = refs[idx]; idx += 1
    pre = []
    for _ in range(n_pre):
        pre.append((refs[idx], refs[idx + 1])); idx += 2
    wqkv_ref = refs[idx]; idx += 1
    post = []
    for _ in range(n_post):
        post.append((refs[idx], refs[idx + 1])); idx += 2
    out_ref = refs[idx]
    alpha_ref = refs[idx + 1]

    t = pl.program_id(1)

    # (TS + 2A, D_in) halo slab: current tile + forward halo from the next one.
    slab = jnp.concatenate([x_cur_ref[0], x_nxt_ref[0]], axis=0)[: TS + 2 * A]

    # Pre-attention MLP, computed once per slab row.
    h = slab.astype(jnp.float32)
    for (w_ref, b_ref), act in zip(pre, acts_pre):
        h = _apply_act(_mm(h, w_ref, b_ref), act)

    # Zero the rows that correspond to sequence padding: the torch module pads
    # the hidden representation with zeros, so Q/K/V of those rows must vanish.
    rows = t * TS + jax.lax.broadcasted_iota(jnp.int32, (TS + 2 * A, 1), 0)
    h = jnp.where((rows >= A) & (rows < A + S), h, 0.0)

    # Fused Q/K/V projection: one (H, 3H) matmul.
    qkv = _mm(h, wqkv_ref)                           # (TS+2A, 3H), f32
    q = qkv[:, :H]
    k = qkv[:, H:2 * H]
    v = qkv[:, 2 * H:]

    # Shifted window views: window slot w of token p is slab row p + 2A - w.
    qw = [q[2 * A - w: 2 * A - w + TS] for w in range(Wn)]
    kw = [k[2 * A - w: 2 * A - w + TS] for w in range(Wn)]
    vw = [v[2 * A - w: 2 * A - w + TS] for w in range(Wn)]

    # d[p, w, u] = <q_w[p], k_u[p]> / sqrt(H); softmax over u (VPU/EUP work).
    alpha_blocks = []
    for w in range(Wn):
        d = jnp.concatenate(
            [jnp.sum(qw[w] * kw[u], axis=-1, keepdims=True) for u in range(Wn)],
            axis=-1) * inv_sqrt_h                    # (TS, Wn)
        m = jnp.max(d, axis=-1, keepdims=True)
        e = jnp.exp(d - m)
        alpha_blocks.append(e / jnp.sum(e, axis=-1, keepdims=True))

    # Lane-dense alpha block: (TS, Wn*Wn), w-major / u-minor ordering.
    alpha_ref[0] = jnp.concatenate(alpha_blocks, axis=-1)

    # out = sum_w (alpha[:, w, :] @ V_window) == (sum_w alpha[:, w, :]) "dot" V:
    beta = alpha_blocks[0]
    for w in range(1, Wn):
        beta = beta + alpha_blocks[w]                # (TS, Wn)
    attn = beta[:, 0:1] * vw[0]
    for u in range(1, Wn):
        attn = attn + beta[:, u:u + 1] * vw[u]       # (TS, H)

    # Post-attention MLP.
    y = attn
    for (w_ref, b_ref), act in zip(post, acts_post):
        y = _apply_act(_mm(y, w_ref, b_ref), act)
    out_ref[0] = y.astype(out_ref.dtype)


# ----------------------------------------------------------------------------
# Wrapper: padding / tiling / BlockSpecs
# ----------------------------------------------------------------------------
def forward(x, params, atten_size, atten_layer_index, activations, seq_tile=256):
    B, S, D_in = x.shape
    A = atten_size
    Wn = 2 * A + 1
    layers = params["layers"]
    n_pre = atten_layer_index
    n_post = len(layers) - n_pre
    H = params["wq"].shape[0]
    D_out = layers[-1][0].shape[1] if n_post > 0 else H

    # Sequence tile: multiple of 8, at least 2A (so a single forward-halo tile
    # suffices), capped at `seq_tile` to bound VMEM.
    TS = max(_round_up(min(seq_tile, _round_up(S, 8)), 8), _round_up(2 * A, 8))
    assert TS >= 2 * A
    num_tiles = _cdiv(S, TS)
    # A leading zero rows + x + trailing zeros, up to (num_tiles + 1) tiles so
    # the "next tile" halo block is always in bounds.
    S_pad = (num_tiles + 1) * TS
    x_padded = jnp.pad(x.astype(jnp.float32),
                       ((0, 0), (A, S_pad - S - A), (0, 0)))

    wqkv = jnp.concatenate([params["wq"], params["wk"], params["wv"]], axis=1)

    inputs = [x_padded, x_padded]
    in_specs = [
        pl.BlockSpec((1, TS, D_in), lambda b, t: (b, t, 0)),       # current tile
        pl.BlockSpec((1, TS, D_in), lambda b, t: (b, t + 1, 0)),   # forward halo
    ]
    for w, bias in layers[:n_pre]:
        inputs += [w, bias]
        in_specs += [pl.BlockSpec(w.shape, lambda b, t: (0, 0)),
                     pl.BlockSpec(bias.shape, lambda b, t: (0, 0))]
    inputs.append(wqkv)
    in_specs.append(pl.BlockSpec(wqkv.shape, lambda b, t: (0, 0)))
    for w, bias in layers[n_pre:]:
        inputs += [w, bias]
        in_specs += [pl.BlockSpec(w.shape, lambda b, t: (0, 0)),
                     pl.BlockSpec(bias.shape, lambda b, t: (0, 0))]

    kernel = functools.partial(
        _fused_kernel, n_pre=n_pre, n_post=n_post, A=A, S=S, TS=TS, H=H,
        inv_sqrt_h=1.0 / math.sqrt(float(H)),
        acts_pre=tuple(activations[:n_pre]),
        acts_post=tuple(activations[n_pre:]),
    )

    out_full, alpha_full = pl.pallas_call(
        kernel,
        grid=(B, num_tiles),
        out_shape=(
            jax.ShapeDtypeStruct((B, num_tiles * TS, D_out), jnp.float32),
            jax.ShapeDtypeStruct((B, num_tiles * TS, Wn * Wn), jnp.float32),
        ),
        in_specs=in_specs,
        out_specs=(
            pl.BlockSpec((1, TS, D_out), lambda b, t: (b, t, 0)),
            pl.BlockSpec((1, TS, Wn * Wn), lambda b, t: (b, t, 0)),
        ),
        compiler_params=pltpu.CompilerParams(
            dimension_semantics=("parallel", "parallel")),
    )(*inputs)

    out = out_full[:, :S, :]
    alpha = alpha_full[:, :S, :].reshape(B * S, Wn, Wn)
    return out, alpha


# ----------------------------------------------------------------------------
# Pure-JAX reference (mirror of the torch forward), for the correctness check.
# ----------------------------------------------------------------------------
def forward_ref(x, params, atten_size, atten_layer_index, activations):
    def act(y, name):
        return jnp.maximum(y, 0.0) if name == "relu" else jnp.tanh(y)

    for i in range(atten_layer_index):
        w, b = params["layers"][i]
        x = act(x @ w + b[None], activations[i])
    B, S, H = x.shape
    A = atten_size
    padded = jnp.pad(x, ((0, 0), (A, A), (0, 0)))
    x_nei = jnp.stack(
        [jnp.roll(padded, k, axis=1) for k in range(-A, A + 1)], axis=2
    )[:, A:-A, :, :].reshape(B * S, 2 * A + 1, H)
    q = x_nei @ params["wq"]
    k = x_nei @ params["wk"]
    v = x_nei @ params["wv"]
    d = jnp.einsum("nwh,nuh->nwu", q, k) / math.sqrt(float(H))
    alpha = jax.nn.softmax(d, axis=2)
    wv = jnp.einsum("nwu,nuh->nwh", alpha, v)
    x = jnp.sum(wv, axis=1).reshape(B, S, H)
    for i in range(atten_layer_index, len(params["layers"])):
        w, b = params["layers"][i]
        x = act(x @ w + b[None], activations[i])
    return x, alpha


# ----------------------------------------------------------------------------
# Deterministic parameter init (xavier_normal matrices, zero biases)
# ----------------------------------------------------------------------------
def init_params(key, layers_dim, atten_layer_index):
    params = {"layers": []}
    keys = jax.random.split(key, len(layers_dim) - 1 + 3)
    for i in range(len(layers_dim) - 1):
        fan_in, fan_out = layers_dim[i], layers_dim[i + 1]
        std = math.sqrt(2.0 / (fan_in + fan_out))
        w = std * jax.random.normal(keys[i], (fan_in, fan_out), jnp.float32)
        b = jnp.zeros((1, fan_out), jnp.float32)
        params["layers"].append((w, b))
    H = layers_dim[atten_layer_index]
    std = math.sqrt(2.0 / (H + H))
    params["wq"] = std * jax.random.normal(keys[-3], (H, H), jnp.float32)
    params["wk"] = std * jax.random.normal(keys[-2], (H, H), jnp.float32)
    params["wv"] = std * jax.random.normal(keys[-1], (H, H), jnp.float32)
    return params


if __name__ == "__main__":
    # Small config consistent with the module:
    #   layers_dim = [4, 32, 6], atten_layer_index = 1 (hidden size 32),
    #   atten_size = 2 (window of 5), activations relu then tanh.
    layers_dim = [4, 32, 6]
    atten_layer_index = 1
    atten_size = 2
    activations = ["relu", "tanh"]
    B, S = 2, 8

    key = jax.random.PRNGKey(0)
    pkey, xkey = jax.random.split(key)
    params = init_params(pkey, layers_dim, atten_layer_index)
    x = jax.random.normal(xkey, (B, S, layers_dim[0]), jnp.float32)

    fwd = jax.jit(lambda xx, pp: forward(xx, pp, atten_size,
                                         atten_layer_index, activations))
    out, alpha = fwd(x, params)
    out = jax.block_until_ready(out)
    alpha = jax.block_until_ready(alpha)

    # sanity check against the pure-JAX reference
    out_ref, alpha_ref = forward_ref(x, params, atten_size,
                                     atten_layer_index, activations)
    assert out.shape == (B, S, layers_dim[-1])
    assert alpha.shape == (B * S, 2 * atten_size + 1, 2 * atten_size + 1)
    assert jnp.allclose(out, out_ref, rtol=2e-2, atol=2e-2)
    assert jnp.allclose(alpha, alpha_ref, rtol=2e-2, atol=2e-2)

    print("KERNEL_OK")
</pallas_src>

<mosaic_0001>
module attributes {stable_mosaic.version = 11 : i64} {
  func.func @_fused_kernel(%arg0: i32, %arg1: i32, %arg2: memref<1x8x4xf32, #tpu.memory_space<vmem>>, %arg3: memref<1x8x4xf32, #tpu.memory_space<vmem>>, %arg4: memref<4x32xf32, #tpu.memory_space<vmem>>, %arg5: memref<1x32xf32, #tpu.memory_space<vmem>>, %arg6: memref<32x96xf32, #tpu.memory_space<vmem>>, %arg7: memref<32x6xf32, #tpu.memory_space<vmem>>, %arg8: memref<1x6xf32, #tpu.memory_space<vmem>>, %arg9: memref<1x8x6xf32, #tpu.memory_space<vmem>>, %arg10: memref<1x8x25xf32, #tpu.memory_space<vmem>>) attributes {dimension_semantics = [#tpu.dimension_semantics<parallel>, #tpu.dimension_semantics<parallel>], iteration_bounds = array<i64: 2, 1>, scalar_prefetch = 0 : i64, scratch_operands = 0 : i64, tpu.core_type = #tpu.core_type<tc>, window_params = [{transform_indices = @transform_0, window_bounds = array<i64: 1, 8, 4>}, {transform_indices = @transform_1, window_bounds = array<i64: 1, 8, 4>}, {pipeline_mode = #tpu.pipeline_mode<synchronous>, transform_indices = @transform_2, window_bounds = array<i64: 4, 32>}, {pipeline_mode = #tpu.pipeline_mode<synchronous>, transform_indices = @transform_3, window_bounds = array<i64: 1, 32>}, {pipeline_mode = #tpu.pipeline_mode<synchronous>, transform_indices = @transform_4, window_bounds = array<i64: 32, 96>}, {pipeline_mode = #tpu.pipeline_mode<synchronous>, transform_indices = @transform_5, window_bounds = array<i64: 32, 6>}, {pipeline_mode = #tpu.pipeline_mode<synchronous>, transform_indices = @transform_6, window_bounds = array<i64: 1, 6>}, {transform_indices = @transform_7, window_bounds = array<i64: 1, 8, 6>}, {transform_indices = @transform_8, window_bounds = array<i64: 1, 8, 25>}]} {
    %c0 = arith.constant 0 : index
    %c0_0 = arith.constant 0 : index
    %c0_1 = arith.constant 0 : index
    %0 = vector.load %arg2[%c0, %c0_0, %c0_1] : memref<1x8x4xf32, #tpu.memory_space<vmem>>, vector<1x8x4xf32>
    %1 = vector.shape_cast %0 : vector<1x8x4xf32> to vector<8x4xf32>
    %c0_2 = arith.constant 0 : index
    %c0_3 = arith.constant 0 : index
    %c0_4 = arith.constant 0 : index
    %2 = vector.load %arg3[%c0_2, %c0_3, %c0_4] : memref<1x8x4xf32, #tpu.memory_space<vmem>>, vector<1x8x4xf32>
    %3 = vector.shape_cast %2 : vector<1x8x4xf32> to vector<8x4xf32>
    %4 = tpu.concatenate %1, %3 in 0 : vector<8x4xf32>, vector<8x4xf32> -> vector<16x4xf32>
    %5 = vector.extract_strided_slice %4 {offsets = [0, 0], sizes = [12, 4], strides = [1, 1]} : vector<16x4xf32> to vector<12x4xf32>
    %6 = arith.truncf %5 : vector<12x4xf32> to vector<12x4xbf16>
    %c0_5 = arith.constant 0 : index
    %c0_6 = arith.constant 0 : index
    %7 = vector.load %arg4[%c0_5, %c0_6] : memref<4x32xf32, #tpu.memory_space<vmem>>, vector<4x32xf32>
    %8 = arith.truncf %7 : vector<4x32xf32> to vector<4x32xbf16>
    %cst = arith.constant dense<0.000000e+00> : vector<12x32xf32>
    %9 = tpu.matmul %6, %8, %cst {dimension_numbers = #tpu.dot_dimension_numbers<[1], [0], [0], [1], [0, 0, 1, 1], [], []>} : vector<12x4xbf16>, vector<4x32xbf16>, vector<12x32xf32> -> vector<12x32xf32>
    %c0_7 = arith.constant 0 : index
    %c0_8 = arith.constant 0 : index
    %10 = vector.load %arg5[%c0_7, %c0_8] : memref<1x32xf32, #tpu.memory_space<vmem>>, vector<1x32xf32>
    %11 = vector.broadcast %10 : vector<1x32xf32> to vector<12x32xf32>
    %12 = arith.addf %9, %11 : vector<12x32xf32>
    %cst_9 = arith.constant 0.000000e+00 : f32
    %13 = vector.broadcast %cst_9 : f32 to vector<12x32xf32>
    %14 = arith.maximumf %12, %13 : vector<12x32xf32>
    %c8_i32 = arith.constant 8 : i32
    %15 = arith.muli %arg1, %c8_i32 : i32
    %16 = tpu.iota {dimensions = array<i32: 0>} : vector<12x1xi32>
    %17 = vector.broadcast %15 : i32 to vector<12x1xi32>
    %18 = arith.addi %17, %16 : vector<12x1xi32>
    %c2_i32 = arith.constant 2 : i32
    %19 = vector.broadcast %c2_i32 : i32 to vector<12x1xi32>
    %20 = arith.cmpi sge, %18, %19 : vector<12x1xi32>
    %c10_i32 = arith.constant 10 : i32
    %21 = vector.broadcast %c10_i32 : i32 to vector<12x1xi32>
    %22 = arith.cmpi slt, %18, %21 : vector<12x1xi32>
    %23 = arith.andi %20, %22 : vector<12x1xi1>
    %cst_10 = arith.constant 0.000000e+00 : f32
    %24 = vector.shape_cast %23 : vector<12x1xi1> to vector<12x1xi1>
    %25 = vector.broadcast %24 : vector<12x1xi1> to vector<12x32xi1>
    %26 = vector.broadcast %cst_10 : f32 to vector<12x32xf32>
    %27 = arith.select %25, %14, %26 : vector<12x32xi1>, vector<12x32xf32>
    %28 = arith.truncf %27 : vector<12x32xf32> to vector<12x32xbf16>
    %c0_11 = arith.constant 0 : index
    %c0_12 = arith.constant 0 : index
    %29 = vector.load %arg6[%c0_11, %c0_12] : memref<32x96xf32, #tpu.memory_space<vmem>>, vector<32x96xf32>
    %30 = arith.truncf %29 : vector<32x96xf32> to vector<32x96xbf16>
    %cst_13 = arith.constant dense<0.000000e+00> : vector<12x96xf32>
    %31 = tpu.matmul %28, %30, %cst_13 {dimension_numbers = #tpu.dot_dimension_numbers<[1], [0], [0], [1], [0, 0, 1, 1], [], []>} : vector<12x32xbf16>, vector<32x96xbf16>, vector<12x96xf32> -> vector<12x96xf32>
    %32 = vector.extract_strided_slice %31 {offsets = [0, 0], sizes = [12, 32], strides = [1, 1]} : vector<12x96xf32> to vector<12x32xf32>
    %33 = vector.extract_strided_slice %31 {offsets = [0, 32], sizes = [12, 32], strides = [1, 1]} : vector<12x96xf32> to vector<12x32xf32>
    %34 = vector.extract_strided_slice %31 {offsets = [0, 64], sizes = [12, 32], strides = [1, 1]} : vector<12x96xf32> to vector<12x32xf32>
    %35 = vector.extract_strided_slice %32 {offsets = [4, 0], sizes = [8, 32], strides = [1, 1]} : vector<12x32xf32> to vector<8x32xf32>
    %36 = vector.extract_strided_slice %32 {offsets = [3, 0], sizes = [8, 32], strides = [1, 1]} : vector<12x32xf32> to vector<8x32xf32>
    %37 = vector.extract_strided_slice %32 {offsets = [2, 0], sizes = [8, 32], strides = [1, 1]} : vector<12x32xf32> to vector<8x32xf32>
    %38 = vector.extract_strided_slice %32 {offsets = [1, 0], sizes = [8, 32], strides = [1, 1]} : vector<12x32xf32> to vector<8x32xf32>
    %39 = vector.extract_strided_slice %32 {offsets = [0, 0], sizes = [8, 32], strides = [1, 1]} : vector<12x32xf32> to vector<8x32xf32>
    %40 = vector.extract_strided_slice %33 {offsets = [4, 0], sizes = [8, 32], strides = [1, 1]} : vector<12x32xf32> to vector<8x32xf32>
    %41 = vector.extract_strided_slice %33 {offsets = [3, 0], sizes = [8, 32], strides = [1, 1]} : vector<12x32xf32> to vector<8x32xf32>
    %42 = vector.extract_strided_slice %33 {offsets = [2, 0], sizes = [8, 32], strides = [1, 1]} : vector<12x32xf32> to vector<8x32xf32>
    %43 = vector.extract_strided_slice %33 {offsets = [1, 0], sizes = [8, 32], strides = [1, 1]} : vector<12x32xf32> to vector<8x32xf32>
    %44 = vector.extract_strided_slice %33 {offsets = [0, 0], sizes = [8, 32], strides = [1, 1]} : vector<12x32xf32> to vector<8x32xf32>
    %45 = vector.extract_strided_slice %34 {offsets = [4, 0], sizes = [8, 32], strides = [1, 1]} : vector<12x32xf32> to vector<8x32xf32>
    %46 = vector.extract_strided_slice %34 {offsets = [3, 0], sizes = [8, 32], strides = [1, 1]} : vector<12x32xf32> to vector<8x32xf32>
    %47 = vector.extract_strided_slice %34 {offsets = [2, 0], sizes = [8, 32], strides = [1, 1]} : vector<12x32xf32> to vector<8x32xf32>
    %48 = vector.extract_strided_slice %34 {offsets = [1, 0], sizes = [8, 32], strides = [1, 1]} : vector<12x32xf32> to vector<8x32xf32>
    %49 = vector.extract_strided_slice %34 {offsets = [0, 0], sizes = [8, 32], strides = [1, 1]} : vector<12x32xf32> to vector<8x32xf32>
    %50 = arith.mulf %35, %40 : vector<8x32xf32>
    %cst_14 = arith.constant dense<0.000000e+00> : vector<8xf32>
    %51 = vector.multi_reduction <add>, %50, %cst_14 [1] : vector<8x32xf32> to vector<8xf32>
    %52 = vector.shape_cast %51 : vector<8xf32> to vector<8x1xf32>
    %53 = arith.mulf %35, %41 : vector<8x32xf32>
    %cst_15 = arith.constant dense<0.000000e+00> : vector<8xf32>
    %54 = vector.multi_reduction <add>, %53, %cst_15 [1] : vector<8x32xf32> to vector<8xf32>
    %55 = vector.shape_cast %54 : vector<8xf32> to vector<8x1xf32>
    %56 = arith.mulf %35, %42 : vector<8x32xf32>
    %cst_16 = arith.constant dense<0.000000e+00> : vector<8xf32>
    %57 = vector.multi_reduction <add>, %56, %cst_16 [1] : vector<8x32xf32> to vector<8xf32>
    %58 = vector.shape_cast %57 : vector<8xf32> to vector<8x1xf32>
    %59 = arith.mulf %35, %43 : vector<8x32xf32>
    %cst_17 = arith.constant dense<0.000000e+00> : vector<8xf32>
    %60 = vector.multi_reduction <add>, %59, %cst_17 [1] : vector<8x32xf32> to vector<8xf32>
    %61 = vector.shape_cast %60 : vector<8xf32> to vector<8x1xf32>
    %62 = arith.mulf %35, %44 : vector<8x32xf32>
    %cst_18 = arith.constant dense<0.000000e+00> : vector<8xf32>
    %63 = vector.multi_reduction <add>, %62, %cst_18 [1] : vector<8x32xf32> to vector<8xf32>
    %64 = vector.shape_cast %63 : vector<8xf32> to vector<8x1xf32>
    %65 = tpu.concatenate %52, %55, %58, %61, %64 in 1 : vector<8x1xf32>, vector<8x1xf32>, vector<8x1xf32>, vector<8x1xf32>, vector<8x1xf32> -> vector<8x5xf32>
    %cst_19 = arith.constant 0.176776692 : f32
    %66 = vector.broadcast %cst_19 : f32 to vector<8x5xf32>
    %67 = arith.mulf %65, %66 : vector<8x5xf32>
    %cst_20 = arith.constant dense<0xFF800000> : vector<8xf32>
    %68 = vector.multi_reduction <maximumf>, %67, %cst_20 [1] : vector<8x5xf32> to vector<8xf32>
    %69 = vector.shape_cast %68 : vector<8xf32> to vector<8x1xf32>
    %70 = vector.broadcast %69 : vector<8x1xf32> to vector<8x5xf32>
    %71 = arith.subf %67, %70 : vector<8x5xf32>
    %72 = math.exp %71 : vector<8x5xf32>
    %cst_21 = arith.constant dense<0.000000e+00> : vector<8xf32>
    %73 = vector.multi_reduction <add>, %72, %cst_21 [1] : vector<8x5xf32> to vector<8xf32>
    %74 = vector.shape_cast %73 : vector<8xf32> to vector<8x1xf32>
    %75 = vector.broadcast %74 : vector<8x1xf32> to vector<8x5xf32>
    %76 = arith.divf %72, %75 : vector<8x5xf32>
    %77 = arith.mulf %36, %40 : vector<8x32xf32>
    %cst_22 = arith.constant dense<0.000000e+00> : vector<8xf32>
    %78 = vector.multi_reduction <add>, %77, %cst_22 [1] : vector<8x32xf32> to vector<8xf32>
    %79 = vector.shape_cast %78 : vector<8xf32> to vector<8x1xf32>
    %80 = arith.mulf %36, %41 : vector<8x32xf32>
    %cst_23 = arith.constant dense<0.000000e+00> : vector<8xf32>
    %81 = vector.multi_reduction <add>, %80, %cst_23 [1] : vector<8x32xf32> to vector<8xf32>
    %82 = vector.shape_cast %81 : vector<8xf32> to vector<8x1xf32>
    %83 = arith.mulf %36, %42 : vector<8x32xf32>
    %cst_24 = arith.constant dense<0.000000e+00> : vector<8xf32>
    %84 = vector.multi_reduction <add>, %83, %cst_24 [1] : vector<8x32xf32> to vector<8xf32>
    %85 = vector.shape_cast %84 : vector<8xf32> to vector<8x1xf32>
    %86 = arith.mulf %36, %43 : vector<8x32xf32>
    %cst_25 = arith.constant dense<0.000000e+00> : vector<8xf32>
    %87 = vector.multi_reduction <add>, %86, %cst_25 [1] : vector<8x32xf32> to vector<8xf32>
    %88 = vector.shape_cast %87 : vector<8xf32> to vector<8x1xf32>
    %89 = arith.mulf %36, %44 : vector<8x32xf32>
    %cst_26 = arith.constant dense<0.000000e+00> : vector<8xf32>
    %90 = vector.multi_reduction <add>, %89, %cst_26 [1] : vector<8x32xf32> to vector<8xf32>
    %91 = vector.shape_cast %90 : vector<8xf32> to vector<8x1xf32>
    %92 = tpu.concatenate %79, %82, %85, %88, %91 in 1 : vector<8x1xf32>, vector<8x1xf32>, vector<8x1xf32>, vector<8x1xf32>, vector<8x1xf32> -> vector<8x5xf32>
    %cst_27 = arith.constant 0.176776692 : f32
    %93 = vector.broadcast %cst_27 : f32 to vector<8x5xf32>
    %94 = arith.mulf %92, %93 : vector<8x5xf32>
    %cst_28 = arith.constant dense<0xFF800000> : vector<8xf32>
    %95 = vector.multi_reduction <maximumf>, %94, %cst_28 [1] : vector<8x5xf32> to vector<8xf32>
    %96 = vector.shape_cast %95 : vector<8xf32> to vector<8x1xf32>
    %97 = vector.broadcast %96 : vector<8x1xf32> to vector<8x5xf32>
    %98 = arith.subf %94, %97 : vector<8x5xf32>
    %99 = math.exp %98 : vector<8x5xf32>
    %cst_29 = arith.constant dense<0.000000e+00> : vector<8xf32>
    %100 = vector.multi_reduction <add>, %99, %cst_29 [1] : vector<8x5xf32> to vector<8xf32>
    %101 = vector.shape_cast %100 : vector<8xf32> to vector<8x1xf32>
    %102 = vector.broadcast %101 : vector<8x1xf32> to vector<8x5xf32>
    %103 = arith.divf %99, %102 : vector<8x5xf32>
    %104 = arith.mulf %37, %40 : vector<8x32xf32>
    %cst_30 = arith.constant dense<0.000000e+00> : vector<8xf32>
    %105 = vector.multi_reduction <add>, %104, %cst_30 [1] : vector<8x32xf32> to vector<8xf32>
    %106 = vector.shape_cast %105 : vector<8xf32> to vector<8x1xf32>
    %107 = arith.mulf %37, %41 : vector<8x32xf32>
    %cst_31 = arith.constant dense<0.000000e+00> : vector<8xf32>
    %108 = vector.multi_reduction <add>, %107, %cst_31 [1] : vector<8x32xf32> to vector<8xf32>
    %109 = vector.shape_cast %108 : vector<8xf32> to vector<8x1xf32>
    %110 = arith.mulf %37, %42 : vector<8x32xf32>
    %cst_32 = arith.constant dense<0.000000e+00> : vector<8xf32>
    %111 = vector.multi_reduction <add>, %110, %cst_32 [1] : vector<8x32xf32> to vector<8xf32>
    %112 = vector.shape_cast %111 : vector<8xf32> to vector<8x1xf32>
    %113 = arith.mulf %37, %43 : vector<8x32xf32>
    %cst_33 = arith.constant dense<0.000000e+00> : vector<8xf32>
    %114 = vector.multi_reduction <add>, %113, %cst_33 [1] : vector<8x32xf32> to vector<8xf32>
    %115 = vector.shape_cast %114 : vector<8xf32> to vector<8x1xf32>
    %116 = arith.mulf %37, %44 : vector<8x32xf32>
    %cst_34 = arith.constant dense<0.000000e+00> : vector<8xf32>
    %117 = vector.multi_reduction <add>, %116, %cst_34 [1] : vector<8x32xf32> to vector<8xf32>
    %118 = vector.shape_cast %117 : vector<8xf32> to vector<8x1xf32>
    %119 = tpu.concatenate %106, %109, %112, %115, %118 in 1 : vector<8x1xf32>, vector<8x1xf32>, vector<8x1xf32>, vector<8x1xf32>, vector<8x1xf32> -> vector<8x5xf32>
    %cst_35 = arith.constant 0.176776692 : f32
    %120 = vector.broadcast %cst_35 : f32 to vector<8x5xf32>
    %121 = arith.mulf %119, %120 : vector<8x5xf32>
    %cst_36 = arith.constant dense<0xFF800000> : vector<8xf32>
    %122 = vector.multi_reduction <maximumf>, %121, %cst_36 [1] : vector<8x5xf32> to vector<8xf32>
    %123 = vector.shape_cast %122 : vector<8xf32> to vector<8x1xf32>
    %124 = vector.broadcast %123 : vector<8x1xf32> to vector<8x5xf32>
    %125 = arith.subf %121, %124 : vector<8x5xf32>
    %126 = math.exp %125 : vector<8x5xf32>
    %cst_37 = arith.constant dense<0.000000e+00> : vector<8xf32>
    %127 = vector.multi_reduction <add>, %126, %cst_37 [1] : vector<8x5xf32> to vector<8xf32>
    %128 = vector.shape_cast %127 : vector<8xf32> to vector<8x1xf32>
    %129 = vector.broadcast %128 : vector<8x1xf32> to vector<8x5xf32>
    %130 = arith.divf %126, %129 : vector<8x5xf32>
    %131 = arith.mulf %38, %40 : vector<8x32xf32>
    %cst_38 = arith.constant dense<0.000000e+00> : vector<8xf32>
    %132 = vector.multi_reduction <add>, %131, %cst_38 [1] : vector<8x32xf32> to vector<8xf32>
    %133 = vector.shape_cast %132 : vector<8xf32> to vector<8x1xf32>
    %134 = arith.mulf %38, %41 : vector<8x32xf32>
    %cst_39 = arith.constant dense<0.000000e+00> : vector<8xf32>
    %135 = vector.multi_reduction <add>, %134, %cst_39 [1] : vector<8x32xf32> to vector<8xf32>
    %136 = vector.shape_cast %135 : vector<8xf32> to vector<8x1xf32>
    %137 = arith.mulf %38, %42 : vector<8x32xf32>
    %cst_40 = arith.constant dense<0.000000e+00> : vector<8xf32>
    %138 = vector.multi_reduction <add>, %137, %cst_40 [1] : vector<8x32xf32> to vector<8xf32>
    %139 = vector.shape_cast %138 : vector<8xf32> to vector<8x1xf32>
    %140 = arith.mulf %38, %43 : vector<8x32xf32>
    %cst_41 = arith.constant dense<0.000000e+00> : vector<8xf32>
    %141 = vector.multi_reduction <add>, %140, %cst_41 [1] : vector<8x32xf32> to vector<8xf32>
    %142 = vector.shape_cast %141 : vector<8xf32> to vector<8x1xf32>
    %143 = arith.mulf %38, %44 : vector<8x32xf32>
    %cst_42 = arith.constant dense<0.000000e+00> : vector<8xf32>
    %144 = vector.multi_reduction <add>, %143, %cst_42 [1] : vector<8x32xf32> to vector<8xf32>
    %145 = vector.shape_cast %144 : vector<8xf32> to vector<8x1xf32>
    %146 = tpu.concatenate %133, %136, %139, %142, %145 in 1 : vector<8x1xf32>, vector<8x1xf32>, vector<8x1xf32>, vector<8x1xf32>, vector<8x1xf32> -> vector<8x5xf32>
    %cst_43 = arith.constant 0.176776692 : f32
    %147 = vector.broadcast %cst_43 : f32 to vector<8x5xf32>
    %148 = arith.mulf %146, %147 : vector<8x5xf32>
    %cst_44 = arith.constant dense<0xFF800000> : vector<8xf32>
    %149 = vector.multi_reduction <maximumf>, %148, %cst_44 [1] : vector<8x5xf32> to vector<8xf32>
    %150 = vector.shape_cast %149 : vector<8xf32> to vector<8x1xf32>
    %151 = vector.broadcast %150 : vector<8x1xf32> to vector<8x5xf32>
    %152 = arith.subf %148, %151 : vector<8x5xf32>
    %153 = math.exp %152 : vector<8x5xf32>
    %cst_45 = arith.constant dense<0.000000e+00> : vector<8xf32>
    %154 = vector.multi_reduction <add>, %153, %cst_45 [1] : vector<8x5xf32> to vector<8xf32>
    %155 = vector.shape_cast %154 : vector<8xf32> to vector<8x1xf32>
    %156 = vector.broadcast %155 : vector<8x1xf32> to vector<8x5xf32>
    %157 = arith.divf %153, %156 : vector<8x5xf32>
    %158 = arith.mulf %39, %40 : vector<8x32xf32>
    %cst_46 = arith.constant dense<0.000000e+00> : vector<8xf32>
    %159 = vector.multi_reduction <add>, %158, %cst_46 [1] : vector<8x32xf32> to vector<8xf32>
    %160 = vector.shape_cast %159 : vector<8xf32> to vector<8x1xf32>
    %161 = arith.mulf %39, %41 : vector<8x32xf32>
    %cst_47 = arith.constant dense<0.000000e+00> : vector<8xf32>
    %162 = vector.multi_reduction <add>, %161, %cst_47 [1] : vector<8x32xf32> to vector<8xf32>
    %163 = vector.shape_cast %162 : vector<8xf32> to vector<8x1xf32>
    %164 = arith.mulf %39, %42 : vector<8x32xf32>
    %cst_48 = arith.constant dense<0.000000e+00> : vector<8xf32>
    %165 = vector.multi_reduction <add>, %164, %cst_48 [1] : vector<8x32xf32> to vector<8xf32>
    %166 = vector.shape_cast %165 : vector<8xf32> to vector<8x1xf32>
    %167 = arith.mulf %39, %43 : vector<8x32xf32>
    %cst_49 = arith.constant dense<0.000000e+00> : vector<8xf32>
    %168 = vector.multi_reduction <add>, %167, %cst_49 [1] : vector<8x32xf32> to vector<8xf32>
    %169 = vector.shape_cast %168 : vector<8xf32> to vector<8x1xf32>
    %170 = arith.mulf %39, %44 : vector<8x32xf32>
    %cst_50 = arith.constant dense<0.000000e+00> : vector<8xf32>
    %171 = vector.multi_reduction <add>, %170, %cst_50 [1] : vector<8x32xf32> to vector<8xf32>
    %172 = vector.shape_cast %171 : vector<8xf32> to vector<8x1xf32>
    %173 = tpu.concatenate %160, %163, %166, %169, %172 in 1 : vector<8x1xf32>, vector<8x1xf32>, vector<8x1xf32>, vector<8x1xf32>, vector<8x1xf32> -> vector<8x5xf32>
    %cst_51 = arith.constant 0.176776692 : f32
    %174 = vector.broadcast %cst_51 : f32 to vector<8x5xf32>
    %175 = arith.mulf %173, %174 : vector<8x5xf32>
    %cst_52 = arith.constant dense<0xFF800000> : vector<8xf32>
    %176 = vector.multi_reduction <maximumf>, %175, %cst_52 [1] : vector<8x5xf32> to vector<8xf32>
    %177 = vector.shape_cast %176 : vector<8xf32> to vector<8x1xf32>
    %178 = vector.broadcast %177 : vector<8x1xf32> to vector<8x5xf32>
    %179 = arith.subf %175, %178 : vector<8x5xf32>
    %180 = math.exp %179 : vector<8x5xf32>
    %cst_53 = arith.constant dense<0.000000e+00> : vector<8xf32>
    %181 = vector.multi_reduction <add>, %180, %cst_53 [1] : vector<8x5xf32> to vector<8xf32>
    %182 = vector.shape_cast %181 : vector<8xf32> to vector<8x1xf32>
    %183 = vector.broadcast %182 : vector<8x1xf32> to vector<8x5xf32>
    %184 = arith.divf %180, %183 : vector<8x5xf32>
    %185 = tpu.concatenate %76, %103, %130, %157, %184 in 1 : vector<8x5xf32>, vector<8x5xf32>, vector<8x5xf32>, vector<8x5xf32>, vector<8x5xf32> -> vector<8x25xf32>
    %c0_54 = arith.constant 0 : index
    %c0_55 = arith.constant 0 : index
    %c0_56 = arith.constant 0 : index
    %186 = vector.load %arg10[%c0_54, %c0_55, %c0_56] : memref<1x8x25xf32, #tpu.memory_space<vmem>>, vector<1x8x25xf32>
    %187 = vector.shape_cast %186 : vector<1x8x25xf32> to vector<8x25xf32>
    %188 = vector.shape_cast %185 : vector<8x25xf32> to vector<1x8x25xf32>
    tpu.vector_store %arg10[%c0_54, %c0_55, %c0_56], %188 {strides = array<i32>} : memref<1x8x25xf32, #tpu.memory_space<vmem>>, vector<1x8x25xf32>,
    %189 = arith.addf %76, %103 : vector<8x5xf32>
    %190 = arith.addf %189, %130 : vector<8x5xf32>
    %191 = arith.addf %190, %157 : vector<8x5xf32>
    %192 = arith.addf %191, %184 : vector<8x5xf32>
    %193 = vector.extract_strided_slice %192 {offsets = [0, 0], sizes = [8, 1], strides = [1, 1]} : vector<8x5xf32> to vector<8x1xf32>
    %194 = vector.broadcast %193 : vector<8x1xf32> to vector<8x32xf32>
    %195 = arith.mulf %194, %45 : vector<8x32xf32>
    %196 = vector.extract_strided_slice %192 {offsets = [0, 1], sizes = [8, 1], strides = [1, 1]} : vector<8x5xf32> to vector<8x1xf32>
    %197 = vector.broadcast %196 : vector<8x1xf32> to vector<8x32xf32>
    %198 = arith.mulf %197, %46 : vector<8x32xf32>
    %199 = arith.addf %195, %198 : vector<8x32xf32>
    %200 = vector.extract_strided_slice %192 {offsets = [0, 2], sizes = [8, 1], strides = [1, 1]} : vector<8x5xf32> to vector<8x1xf32>
    %201 = vector.broadcast %200 : vector<8x1xf32> to vector<8x32xf32>
    %202 = arith.mulf %201, %47 : vector<8x32xf32>
    %203 = arith.addf %199, %202 : vector<8x32xf32>
    %204 = vector.extract_strided_slice %192 {offsets = [0, 3], sizes = [8, 1], strides = [1, 1]} : vector<8x5xf32> to vector<8x1xf32>
    %205 = vector.broadcast %204 : vector<8x1xf32> to vector<8x32xf32>
    %206 = arith.mulf %205, %48 : vector<8x32xf32>
    %207 = arith.addf %203, %206 : vector<8x32xf32>
    %208 = vector.extract_strided_slice %192 {offsets = [0, 4], sizes = [8, 1], strides = [1, 1]} : vector<8x5xf32> to vector<8x1xf32>
    %209 = vector.broadcast %208 : vector<8x1xf32> to vector<8x32xf32>
    %210 = arith.mulf %209, %49 : vector<8x32xf32>
    %211 = arith.addf %207, %210 : vector<8x32xf32>
    %212 = arith.truncf %211 : vector<8x32xf32> to vector<8x32xbf16>
    %c0_57 = arith.constant 0 : index
    %c0_58 = arith.constant 0 : index
    %213 = vector.load %arg7[%c0_57, %c0_58] : memref<32x6xf32, #tpu.memory_space<vmem>>, vector<32x6xf32>
    %214 = arith.truncf %213 : vector<32x6xf32> to vector<32x6xbf16>
    %cst_59 = arith.constant dense<0.000000e+00> : vector<8x6xf32>
    %215 = tpu.matmul %212, %214, %cst_59 {dimension_numbers = #tpu.dot_dimension_numbers<[1], [0], [0], [1], [0, 0, 1, 1], [], []>} : vector<8x32xbf16>, vector<32x6xbf16>, vector<8x6xf32> -> vector<8x6xf32>
    %c0_60 = arith.constant 0 : index
    %c0_61 = arith.constant 0 : index
    %216 = vector.load %arg8[%c0_60, %c0_61] : memref<1x6xf32, #tpu.memory_space<vmem>>, vector<1x6xf32>
    %217 = vector.broadcast %216 : vector<1x6xf32> to vector<8x6xf32>
    %218 = arith.addf %215, %217 : vector<8x6xf32>
    %219 = math.tanh %218 : vector<8x6xf32>
    %c0_62 = arith.constant 0 : index
    %c0_63 = arith.constant 0 : index
    %c0_64 = arith.constant 0 : index
    %220 = vector.load %arg9[%c0_62, %c0_63, %c0_64] : memref<1x8x6xf32, #tpu.memory_space<vmem>>, vector<1x8x6xf32>
    %221 = vector.shape_cast %220 : vector<1x8x6xf32> to vector<8x6xf32>
    %222 = vector.shape_cast %219 : vector<8x6xf32> to vector<1x8x6xf32>
    tpu.vector_store %arg9[%c0_62, %c0_63, %c0_64], %222 {strides = array<i32>} : memref<1x8x6xf32, #tpu.memory_space<vmem>>, vector<1x8x6xf32>,
    return
  }
  func.func @transform_0(%arg0: i32, %arg1: i32) -> (i32, i32, i32) {
    %c0_i32 = arith.constant 0 : i32
    %c0_i32_0 = arith.constant 0 : i32
    return %arg0, %arg1, %c0_i32 : i32, i32, i32
  }
  func.func @transform_1(%arg0: i32, %arg1: i32) -> (i32, i32, i32) {
    %c1_i32 = arith.constant 1 : i32
    %0 = arith.addi %arg1, %c1_i32 : i32
    %c0_i32 = arith.constant 0 : i32
    %c0_i32_0 = arith.constant 0 : i32
    return %arg0, %0, %c0_i32 : i32, i32, i32
  }
  func.func @transform_2(%arg0: i32, %arg1: i32) -> (i32, i32) {
    %c0_i32 = arith.constant 0 : i32
    %c0_i32_0 = arith.constant 0 : i32
    %c0_i32_1 = arith.constant 0 : i32
    return %c0_i32, %c0_i32_0 : i32, i32
  }
  func.func @transform_3(%arg0: i32, %arg1: i32) -> (i32, i32) {
    %c0_i32 = arith.constant 0 : i32
    %c0_i32_0 = arith.constant 0 : i32
    %c0_i32_1 = arith.constant 0 : i32
    return %c0_i32, %c0_i32_0 : i32, i32
  }
  func.func @transform_4(%arg0: i32, %arg1: i32) -> (i32, i32) {
    %c0_i32 = arith.constant 0 : i32
    %c0_i32_0 = arith.constant 0 : i32
    %c0_i32_1 = arith.constant 0 : i32
    return %c0_i32, %c0_i32_0 : i32, i32
  }
  func.func @transform_5(%arg0: i32, %arg1: i32) -> (i32, i32) {
    %c0_i32 = arith.constant 0 : i32
    %c0_i32_0 = arith.constant 0 : i32
    %c0_i32_1 = arith.constant 0 : i32
    return %c0_i32, %c0_i32_0 : i32, i32
  }
  func.func @transform_6(%arg0: i32, %arg1: i32) -> (i32, i32) {
    %c0_i32 = arith.constant 0 : i32
    %c0_i32_0 = arith.constant 0 : i32
    %c0_i32_1 = arith.constant 0 : i32
    return %c0_i32, %c0_i32_0 : i32, i32
  }
  func.func @transform_7(%arg0: i32, %arg1: i32) -> (i32, i32, i32) {
    %c0_i32 = arith.constant 0 : i32
    %c0_i32_0 = arith.constant 0 : i32
    return %arg0, %arg1, %c0_i32 : i32, i32, i32
  }
  func.func @transform_8(%arg0: i32, %arg1: i32) -> (i32, i32, i32) {
    %c0_i32 = arith.constant 0 : i32
    %c0_i32_0 = arith.constant 0 : i32
    return %arg0, %arg1, %c0_i32 : i32, i32, i32
  }
}

</mosaic_0001>

<bundles_post_ra>
// kernel: _lambda_.1
= control target key start
LH: loop header
LB: loop body
LE: loop exit
PB: predicated region body
PF: predicated region fallthrough
CT: control target
= control target key end

     0   :  { %s1524_s27 = smov 0   ;;  %s1526_s28 = smov 0   ;;  %s1991_s0 = inlined_call_operand.vmem [shape: f32[2,16,4], index: 0, kind: input, shape index: {}, may-alias: {0,1}]   ;;  %s1992_s1 = inlined_call_operand.vmem [shape: f32[2,16,4], index: 1, kind: input, shape index: {}, may-alias: {0,1}]   ;;  %s1993_s2 = inlined_call_operand.vmem [shape: f32[4,32], index: 2, kind: input, shape index: {}]   ;;  %s1994_s3 = inlined_call_operand.vmem [shape: f32[1,32], index: 3, kind: input, shape index: {}]   ;;  %s1995_s4 = inlined_call_operand.vmem [shape: f32[32,96], index: 4, kind: input, shape index: {}]   ;;  %s1996_s5 = inlined_call_operand.vmem [shape: f32[32,6], index: 5, kind: input, shape index: {}]   ;;  %s1997_s6 = inlined_call_operand.vmem [shape: f32[1,6], index: 6, kind: input, shape index: {}]   ;;  %s1998_s7 = inlined_call_operand.vmem [shape: f32[2,8,6], index: 7, kind: output, shape index: {0}]   ;;  %s1999_s8 = inlined_call_operand.vmem [shape: f32[2,8,25], index: 8, kind: output, shape index: {1}]  }
   0x1   :  { %s1528_s29 = smov 0  }
   0x2 LB: > { %s31_s30 = sadd.s32 1, %s1460_s28  ;;  %p1308_p0 = scmp.ge.s32.totalorder %s1464_s29, 1  ;;  %s1464_s29 = sphi %s1528_s29, %s19_s29   ;;  %s1460_s28 = sphi %s1526_s28, %s2003_s28   ;;  %s1456_s27 = sphi %s1524_s27, %s2002_s27  }
   0x3   : > { %p33_p1 = scmp.ge.s32.totalorder %s31_s30, 2  ;;  %p305_p2 = scmp.lt.s32.totalorder %s1464_s29, 3 }
   0x5   : > { %s2005_s30 = smov (%p33_p1, %s31_s30), 0  ;;  %p306_p3 = pnand %p1308_p0, %p305_p2 }
   0x6   : > { %v396_v0 = vld [vmem:[%s1993_s2] sm:$0xf] (!%p306_p3)  ;;  %vm409_vm0 = vcmask (!%p306_p3), 1041408   ;;  %p360_p4 = scmp.lt.s32.totalorder (!%p306_p3), %s1456_s27, 1  ;;  %v1466_v1 = vmov (!%p306_p3), 0.0   ;;  %vm1467_vm1 = vmmov (!%p306_p3), 0   ;;  %v457_v13 = vlaneseq (!%p306_p3) }
   0x7   : > { %309 = sbr.rel (%p306_p3) target bundleno = 1758 (0x6de), region = 48  ;;  %1334 = vmatprep.subr.bf16.mxu0 (!%p306_p3), %v1466_v1  ;;  %v397_v2 = vpack.c.bf16 (!%p306_p3), %v396_v0, %v396_v0  ;;  %1336 = vmatprep.mubr.msk.bf16.mxu0 (!%p306_p3), %vm1467_vm1, %v1466_v1  ;;  %vm405_vm2 = vcmask (!%p306_p3), 31744   ;;  %v476_v7 = vld [vmem:[%s1995_s4] sm:$0xff] (!%p306_p3)  ;;  %v477_v8 = vld [vmem:[%s1995_s4 + $0x8] sm:$0xff] (!%p306_p3)  ;;  %v478_v10 = vld [vmem:[%s1995_s4 + $0x10] sm:$0xff] (!%p306_p3)  ;;  %vm2000_vm5 = vcmask (!%p306_p3), 261120  }
   0x8   : > { %1340 = vmatprep.subr.bf16.mxu1 (!%p306_p3), %v1466_v1  ;;  %1344 = vmatprep.mubr.msk.bf16.mxu1 (!%p306_p3), %vm1467_vm1, %v1466_v1  ;;  %v480_v9 = vpack.c.bf16 (!%p306_p3), %v477_v8, %v476_v7  ;;  %v479_v11 = vld [vmem:[%s1995_s4 + $0x18] sm:$0xff] (!%p306_p3)  ;;  %v458_v14 = vshrl.u32 (!%p306_p3), %v457_v13, 7  ;;  %v1315_v15 = vld [vmem:[%s1994_s3] ss:$0 sm:$0xff] (!%p306_p3)  ;;  %vm647_vm6 = vcmask (!%p306_p3), 1046528   ;;  %vm805_vm7 = vcmask (!%p306_p3), 1044480  }
   0x9   : > { %v411_v3 = vsel (!%p306_p3), %vm409_vm0, %v397_v2, 0  ;;  %v481_v12 = vpack.c.bf16 (!%p306_p3), %v479_v11, %v478_v10  ;;  %vm726_vm8 = vcmask (!%p306_p3), 1045504   ;;  %vm545_vm9 = vcmask (!%p306_p3), 1040384   ;;  %s1469_s12 = smov (!%p306_p3), 64   ;;  %s1475_s13 = smov (!%p306_p3), 5  }
   0xa   : > { %1335 = vmatpush3.bf16.msra.mxu0 (!%p306_p3), %v411_v3  ;;  %1341 = vmatpush3.bf16.msra.mxu1 (!%p306_p3), %v480_v9  ;;  %v459_v17 = vadd.s32 (!%p306_p3), 8, %v458_v14  ;;  %vm463_vm3 = vcmp.ge.s32.totalorder (!%p306_p3), %v458_v14, 2  ;;  %vm580_vm10 = vcmask (!%p306_p3), 1042432   ;;  %vm884_vm11 = vcmask (!%p306_p3), 1043456   ;;  %s1476_s22 = smov (!%p306_p3), 10   ;;  %s1477_s23 = smov (!%p306_p3), 15  }
   0xb   : > { %1348 = vmatprep.subr.bf16.mxu0 (!%p306_p3), %v1466_v1  ;;  %1342 = vmatprep.subr.bf16.mxu1 (!%p306_p3), %v1466_v1  ;;  %vm659_vm12 = vcmask (!%p306_p3), 261123   ;;  %vm537_vm13 = vcmask (!%p306_p3), 261124   ;;  %vm663_vm14 = vcmask (!%p306_p3), 256000   ;;  %vm738_vm15 = vcmask (!%p306_p3), 261122   ;;  %s1478_s24 = smov (!%p306_p3), 20  }
   0xc   : > { %vm466_vm4 = vcmp.lt.s32.totalorder (!%p306_p3), %v459_v17, 10 }
   0xe   : > { %s2007_s27 = smov (!%p360_p4, %s1456_s27), 1  ;;  %1343 = vmatpush3.bf16.msra.mxu1 %v481_v12 }
   0xf   : > { %s1322_s11 = sshll.u32 %s2007_s27, 4  ;;  %s1313_s25 = sshll.u32 %s2007_s27, 3 }
  0x10   : > { %s367_s14 = scalar_lea.vmem %s1991_s0, %s1322_s11  ;;  %s1324_s15 = sadd.s32 8, %s1322_s11 }
  0x11   : > { %s376_s18 = scalar_lea.vmem %s1992_s1, %s1324_s15  ;;  %v393_v4 = vld [vmem:[%s367_s14] sm:$0xff]  ;;  %s1468_s11 = smov 96  }
  0x12   : > { %v394_v5 = vld [vmem:[%s376_s18] sm:$0xff]  ;;  %s391_s10 = scalar_lea.vmem %s1999_s8, %s1313_s25  ;;  %s384_s15 = scalar_lea.vmem %s1998_s7, %s1313_s25 }
  0x13   : > { %v395_v6 = vpack.c.bf16 %v394_v5, %v393_v4 }
  0x15   : > { %1337 = vmatmul.mubr.msk.bf16.vlgmr.msra.gmra.mrb[0].mxu0 %vm405_vm2, %v395_v6 }
  0x16   : > { %1352 = vmatprep.mubr.msk.bf16.mxu0 %vm1467_vm1, %v1466_v1  ;;  %vm541_vm1 = vcmask 257024  }
  0xe8   : > { %v447_v16 = vpop.f32.mrb[0].mxu0 }
  0xe9   : > { %v448_v18 = vadd.f32 %v1315_v15, %v447_v16  ;;  %v1338_v19 = vpop.f32.mrb[1].mxu0 }
  0xea   : > { %v450_v20 = vpop.f32.mrb[2].mxu0 }
  0xeb   : > { %v454_v21 = vmax.f32 %v448_v18, 0.0  ;;  %v451_v22 = vadd.f32 %v1315_v15, %v450_v20  ;;  %v1339_v23 = vpop.f32.mrb[3].mxu0 }
  0xed   : > { %v455_v24 = vmax.f32 %v451_v22, 0.0  ;;  %v473_v25 = vsel %vm463_vm3, %v454_v21, 0.0  ;;  %vm817_vm3 = vcmask 261121  }
  0xef   : > { %v474_v26 = vsel %vm466_vm4, %v455_v24, 0.0  ;;  %vm742_vm4 = vcmask 254976  }
  0xf0   : > { %v475_v27 = vpack.c.bf16 %v474_v26, %v473_v25 }
  0xf2   : > { %1345 = vmatmul.mubr.msk.bf16.vlgmr.msra.gmra.mrb[0].mxu1 %vm2000_vm5, %v475_v27 }
 0x1c5   : > { %v1582_v28 = vpop.f32.mrb[0].mxu1 }
 0x1c6   : > { %529 = vrot.lane.b32.xlu0 %v1582_v28, %s1468_s11  ;;  %v1346_v29 = vpop.f32.mrb[1].mxu1  ;;  %v648_v34 = vrot.slane %v1582_v28, 1  ;;  %v806_v36 = vrot.slane %v1582_v28, 3  ;;  %v727_v37 = vrot.slane %v1582_v28, 2  ;;  %v1598_v41 = vrot.slane %v1582_v28, 7 }
 0x1c7   : > { %v1586_v30 = vpop.f32.mrb[2].mxu1  ;;  %v1604_v42 = vrot.slane %v1582_v28, 6  ;;  %v1611_v44 = vrot.slane %v1582_v28, 5  ;;  %v1623_v47 = vrot.slane %v1582_v28, 4 }
 0x1c8   : > { %v1347_v31 = vpop.f32.mrb[3].mxu1  ;;  %v649_v32 = vrot.slane %v1586_v30, 1  ;;  %v728_v33 = vrot.slane %v1586_v30, 2  ;;  %v807_v35 = vrot.slane %v1586_v30, 3  ;;  %v547_v43 = vrot.slane %v1586_v30, 7 }
 0x1c9   : > { %v564_v46 = vrot.slane %v1586_v30, 6  ;;  %v582_v49 = vrot.slane %v1586_v30, 5  ;;  %v885_v51 = vrot.slane %v1586_v30, 4 }
 0x1ca   : > { %531 = vrot.lane.b32.xlu0 %v1586_v30, %s1468_s11  ;;  %653 = vrot.lane.b32.xlu1 %v649_v32, %s1468_s11  ;;  %v650_v38 = vsel %vm647_vm6, %v648_v34, %v649_v32  ;;  %v808_v39 = vsel %vm805_vm7, %v806_v36, %v807_v35  ;;  %v729_v40 = vsel %vm726_vm8, %v727_v37, %v728_v33  ;;  %vm821_vm6 = vcmask 253952  }
 0x1cb   : > { %v1615_v45 = vsel %vm545_vm9, %v1598_v41, %v547_v43  ;;  %v1627_v48 = vsel %vm409_vm0, %v1604_v42, %v564_v46  ;;  %v1638_v50 = vsel %vm580_vm10, %v1611_v44, %v582_v49  ;;  %v886_v52 = vsel %vm884_vm11, %v1623_v47, %v885_v51 }
 0x1cc   : > { %vm610_vm7 = vcmask 7168   ;;  %vm613_vm8 = vcmask 15360   ;;  %vm616_vm11 = vcmask 23552  }
 0x1ce   : > { %549 = vrot.lane.b32.xlu0 %v1598_v41, %s1468_s11  ;;  %732 = vrot.lane.b32.xlu1 %v728_v33, %s1468_s11 }
 0x1d2   : > { %566 = vrot.lane.b32.xlu0 %v1604_v42, %s1468_s11  ;;  %651 = vrot.lane.b32.xlu1 %v650_v38, %s1468_s11 }
 0x1d6   : > { %584 = vrot.lane.b32.xlu0 %v1611_v44, %s1468_s11  ;;  %551 = vrot.lane.b32.xlu1 %v1615_v45, %s1468_s11 }
 0x1da   : > { %599 = vrot.lane.b32.xlu0 %v1623_v47, %s1468_s11  ;;  %568 = vrot.lane.b32.xlu1 %v1627_v48, %s1468_s11 }
 0x1de   : > { %811 = vrot.lane.b32.xlu0 %v807_v35, %s1468_s11  ;;  %809 = vrot.lane.b32.xlu1 %v808_v39, %s1468_s11 }
 0x1e2   : > { %730 = vrot.lane.b32.xlu0 %v729_v40, %s1468_s11  ;;  %586 = vrot.lane.b32.xlu1 %v1638_v50, %s1468_s11 }
 0x1e6   : > { %887 = vrot.lane.b32.xlu1 %v886_v52, %s1468_s11 }
 0x238   : > { %v530_v53 = vpop.permute.xlu0 %529 }
 0x239   : > { %v1647_v54 = vmul.f32 %v530_v53, %v1582_v28 }
 0x23b   : > { %v667_v55 = vsel %vm659_vm12, %v1647_v54, 0.0  ;;  %v538_v56 = vsel %vm537_vm13, %v1647_v54, 0.0  ;;  %v752_v61 = vsel %vm738_vm15, %v1647_v54, 0.0  ;;  %v837_v3 = vsel %vm817_vm3, %v1647_v54, 0.0 }
 0x23c   : > { %v532_v57 = vpop.permute.xlu0 %531  ;;  %668 = vadd.xlane.f32.xlu0 %v667_v55  ;;  %v1653_v58 = vpop.permute.xlu1 %653  ;;  %539 = vadd.xlane.f32.xlu1 %v538_v56 }
 0x23d   : > { %v536_v59 = vmul.f32 %v532_v57, %v1586_v30  ;;  %v658_v49 = vmul.f32 %v1653_v58, %v1586_v30 }
 0x23f   : > { %v670_v60 = vsel %vm663_vm14, %v536_v59, 0.0  ;;  %v542_v2 = vsel %vm541_vm1, %v536_v59, 0.0  ;;  %v755_v19 = vsel %vm742_vm4, %v536_v59, 0.0  ;;  %v840_v37 = vsel %vm821_vm6, %v536_v59, 0.0 }
 0x240   : > { %v550_v62 = vpop.permute.xlu0 %549  ;;  %671 = vadd.xlane.f32.xlu0 %v670_v60  ;;  %v733_v63 = vpop.permute.xlu1 %732  ;;  %753 = vadd.xlane.f32.xlu1 %v752_v61  ;;  %v749_v57 = vsel %vm742_vm4, %v658_v49, 0.0 }
 0x241   : > { %v1660_v0 = vmul.f32 %v550_v62, %v1582_v28  ;;  %v843_v39 = vmul.f32 %v550_v62, %v1586_v30  ;;  %v737_v40 = vmul.f32 %v733_v63, %v1586_v30 }
 0x243   : > { %v673_v8 = vsel %vm659_vm12, %v1660_v0, 0.0  ;;  %v557_v20 = vsel %vm537_vm13, %v1660_v0, 0.0  ;;  %v758_v38 = vsel %vm738_vm15, %v1660_v0, 0.0  ;;  %v847_v43 = vsel %vm821_vm6, %v843_v39, 0.0 }
 0x244   : > { %v567_v4 = vpop.permute.xlu0 %566  ;;  %543 = vadd.xlane.f32.xlu0 %v542_v2  ;;  %v652_v5 = vpop.permute.xlu1 %651  ;;  %838 = vadd.xlane.f32.xlu1 %v837_v3  ;;  %v743_v52 = vsel %vm742_vm4, %v737_v40, 0.0  ;;  %v844_v58 = vsel %vm817_vm3, %v1660_v0, 0.0  ;;  %v828_v63 = vsel %vm821_vm6, %v737_v40, 0.0  ;;  %v664_v2 = vsel %vm663_vm14, %v658_v49, 0.0 }
 0x245   : > { %v1666_v6 = vmul.f32 %v652_v5, %v1582_v28  ;;  %v572_v7 = vmul.f32 %v567_v4, %v1582_v28  ;;  %v764_v22 = vmul.f32 %v567_v4, %v1586_v30  ;;  %v834_v3 = vsel %vm821_vm6, %v658_v49, 0.0 }
 0x247   : > { %v1673_v11 = vsel %vm817_vm3, %v1666_v6, 0.0  ;;  %v679_v15 = vsel %vm659_vm12, %v572_v7, 0.0  ;;  %v768_v29 = vsel %vm742_vm4, %v764_v22, 0.0  ;;  %v574_v35 = vsel %vm537_vm13, %v572_v7, 0.0 }
 0x248   : > { %v585_v9 = vpop.permute.xlu0 %584  ;;  %674 = vadd.xlane.f32.xlu1 %v673_v8  ;;  %v552_v10 = vpop.permute.xlu1 %551  ;;  %v765_v53 = vsel %vm738_vm15, %v572_v7, 0.0  ;;  %v660_v0 = vsel %vm659_vm12, %v1666_v6, 0.0  ;;  %v746_v7 = vsel %vm738_vm15, %v1666_v6, 0.0 }
 0x249   : > { %v685_v12 = vmul.f32 %v585_v9, %v1586_v30  ;;  %v1677_v13 = vmul.f32 %v552_v10, %v1586_v30  ;;  %v590_v21 = vmul.f32 %v585_v9, %v1582_v28 }
 0x24b   : > { %v689_v14 = vsel %vm663_vm14, %v685_v12, 0.0  ;;  %v1683_v17 = vsel %vm541_vm1, %v1677_v13, 0.0  ;;  %v686_v31 = vsel %vm659_vm12, %v590_v21, 0.0  ;;  %v592_v46 = vsel %vm537_vm13, %v590_v21, 0.0 }
 0x24c   : > { %690 = vadd.xlane.f32.xlu0 %v689_v14  ;;  %680 = vadd.xlane.f32.xlu1 %v679_v15  ;;  %v569_v16 = vpop.permute.xlu1 %568  ;;  %v600_v25 = vpop.permute.xlu0 %599  ;;  %v676_v8 = vsel %vm663_vm14, %v1677_v13, 0.0  ;;  %vm623_vm12 = vcmask 39940  }
 0x24d   : > { %v573_v18 = vmul.f32 %v569_v16, %v1586_v30  ;;  %v603_v27 = vmul.f32 %v600_v25, %v1586_v30  ;;  %v602_v51 = vmul.f32 %v600_v25, %v1582_v28  ;;  %v761_v16 = vsel %vm742_vm4, %v1677_v13, 0.0 }
 0x24e   : > { %vm627_vm4 = vcmask 35840  }
 0x24f   : > { %v1692_v23 = vsel %vm663_vm14, %v573_v18, 0.0  ;;  %v1695_v24 = vsel %vm541_vm1, %v573_v18, 0.0  ;;  %v607_v34 = vsel %vm541_vm1, %v603_v27, 0.0  ;;  %v604_v59 = vsel %vm537_vm13, %v602_v51, 0.0 }
 0x250   : > { %756 = vadd.xlane.f32.xlu0 %v755_v19  ;;  %558 = vadd.xlane.f32.xlu1 %v557_v20  ;;  %v810_v26 = vpop.permute.xlu1 %809  ;;  %v812_v55 = vpop.permute.xlu0 %811  ;;  %v903_v19 = vsel %vm2000_vm5, %v1647_v54, 0.0  ;;  %vm702_vm13 = vcmask 39939   ;;  %vm781_vm14 = vcmask 39938  }
 0x251   : > { %v816_v56 = vmul.f32 %v812_v55, %v1586_v30  ;;  %v815_v5 = vmul.f32 %v810_v26, %v1582_v28 }
 0x253   : > { %v822_v60 = vsel %vm821_vm6, %v816_v56, 0.0  ;;  %v818_v9 = vsel %vm817_vm3, %v815_v5, 0.0  ;;  %vm864_vm6 = vcmask 32768  }
 0x254   : > { %769 = vadd.xlane.f32.xlu0 %v768_v29  ;;  %687 = vadd.xlane.f32.xlu1 %v686_v31  ;;  %v587_v32 = vpop.permute.xlu1 %586  ;;  %v731_v61 = vpop.permute.xlu0 %730 }
 0x255   : > { %v591_v33 = vmul.f32 %v587_v32, %v1586_v30  ;;  %v736_v62 = vmul.f32 %v731_v61, %v1582_v28 }
 0x257   : > { %v1704_v36 = vsel %vm541_vm1, %v591_v33, 0.0  ;;  %v739_v4 = vsel %vm738_vm15, %v736_v62, 0.0  ;;  %v825_v10 = vsel %vm817_vm3, %v736_v62, 0.0  ;;  %v897_v18 = vsel %vm2000_vm5, %v736_v62, 0.0 }
 0x258   : > { %608 = vadd.xlane.f32.xlu0 %v607_v34  ;;  %575 = vadd.xlane.f32.xlu1 %v574_v35  ;;  %v888_v12 = vpop.permute.xlu1 %887  ;;  %vm706_vm15 = vcmask 34816   ;;  %vm860_vm1 = vcmask 39937   ;;  %vm785_vm3 = vcmask 33792  }
 0x259   : > { %v890_v14 = vmul.f32 %v888_v12, %v1582_v28 }
 0x25b   : > { %v891_v15 = vsel %vm2000_vm5, %v890_v14, 0.0 }
 0x25c   : > { %841 = vadd.xlane.f32.xlu0 %v840_v37  ;;  %759 = vadd.xlane.f32.xlu1 %v758_v38 }
 0x260   : > { %848 = vadd.xlane.f32.xlu0 %v847_v43  ;;  %593 = vadd.xlane.f32.xlu1 %v592_v46 }
 0x264   : > { %744 = vadd.xlane.f32.xlu0 %v743_v52  ;;  %766 = vadd.xlane.f32.xlu1 %v765_v53 }
 0x268   : > { %750 = vadd.xlane.f32.xlu0 %v749_v57  ;;  %605 = vadd.xlane.f32.xlu1 %v604_v59 }
 0x26c   : > { %823 = vadd.xlane.f32.xlu0 %v822_v60  ;;  %845 = vadd.xlane.f32.xlu1 %v844_v58 }
 0x270   : > { %829 = vadd.xlane.f32.xlu0 %v828_v63  ;;  %665 = vadd.xlane.f32.xlu1 %v664_v2 }
 0x274   : > { %835 = vadd.xlane.f32.xlu0 %v834_v3  ;;  %740 = vadd.xlane.f32.xlu1 %v739_v4 }
 0x278   : > { %661 = vadd.xlane.f32.xlu0 %v660_v0  ;;  %747 = vadd.xlane.f32.xlu1 %v746_v7 }
 0x27c   : > { %677 = vadd.xlane.f32.xlu0 %v676_v8  ;;  %819 = vadd.xlane.f32.xlu1 %v818_v9 }
 0x280   : > { %683 = vadd.xlane.f32.xlu0 %v1692_v23  ;;  %826 = vadd.xlane.f32.xlu1 %v825_v10 }
 0x284   : > { %561 = vadd.xlane.f32.xlu0 %v1683_v17  ;;  %832 = vadd.xlane.f32.xlu1 %v1673_v11  ;;  %v894_v11 = vsel %vm2000_vm5, %v815_v5, 0.0  ;;  %v900_v17 = vsel %vm2000_vm5, %v1666_v6, 0.0  ;;  %vm911_vm5 = vcmask 39936  }
 0x288   : > { %578 = vadd.xlane.f32.xlu0 %v1695_v24  ;;  %892 = vadd.xlane.f32.xlu1 %v891_v15 }
 0x28c   : > { %762 = vadd.xlane.f32.xlu0 %v761_v16  ;;  %898 = vadd.xlane.f32.xlu1 %v897_v18 }
 0x290   : > { %596 = vadd.xlane.f32.xlu0 %v1704_v36  ;;  %904 = vadd.xlane.f32.xlu1 %v903_v19 }
 0x294   : > { %895 = vadd.xlane.f32.xlu0 %v894_v11 }
 0x298   : > { %901 = vadd.xlane.f32.xlu0 %v900_v17 }
 0x2c9   : > { %v669_v20 = vpop.xlane.xlu0 %668  ;;  %v540_v21 = vpop.xlane.xlu1 %539 }
 0x2cd   : > { %v754_v13 = vpop.xlane.xlu1 %753  ;;  %v672_v22 = vpop.xlane.xlu0 %671 }
 0x2d1   : > { %v1753_v23 = vpop.xlane.xlu1 %838  ;;  %v1755_v24 = vpop.xlane.xlu0 %543 }
 0x2d5   : > { %v675_v25 = vpop.xlane.xlu1 %674 }
 0x2d9   : > { %v691_v54 = vpop.xlane.xlu0 %690  ;;  %v681_v26 = vpop.xlane.xlu1 %680 }
 0x2dd   : > { %v1757_v27 = vpop.xlane.xlu0 %756  ;;  %v559_v29 = vpop.xlane.xlu1 %558 }
 0x2de   : > { %v611_v40 = vsel %vm610_vm7, %v540_v21, %v559_v29 }
 0x2e1   : > { %v1759_v31 = vpop.xlane.xlu0 %769  ;;  %v688_v32 = vpop.xlane.xlu1 %687 }
 0x2e5   : > { %v1761_v33 = vpop.xlane.xlu0 %608  ;;  %v576_v6 = vpop.xlane.xlu1 %575 }
 0x2e6   : > { %v614_v43 = vsel %vm613_vm8, %v611_v40, %v576_v6 }
 0x2e9   : > { %v1763_v34 = vpop.xlane.xlu0 %841  ;;  %v760_v35 = vpop.xlane.xlu1 %759 }
 0x2ed   : > { %v1765_v36 = vpop.xlane.xlu0 %848  ;;  %v594_v37 = vpop.xlane.xlu1 %593 }
 0x2ee   : > { %v617_v46 = vsel %vm616_vm11, %v614_v43, %v594_v37 }
 0x2f1   : > { %v745_v38 = vpop.xlane.xlu0 %744  ;;  %v767_v39 = vpop.xlane.xlu1 %766 }
 0x2f5   : > { %v751_v49 = vpop.xlane.xlu0 %750  ;;  %v606_v51 = vpop.xlane.xlu1 %605 }
 0x2f6   : > { %v619_v52 = vsel %vm405_vm2, %v617_v46, %v606_v51  ;;  %v772_v40 = vsel %vm610_vm7, %v745_v38, %v751_v49 }
 0x2f7   : > { %v1771_v53 = vmul.f32 0.17677669, %v619_v52 }
 0x2f9   : > { %v824_v55 = vpop.xlane.xlu0 %823  ;;  %v846_v56 = vpop.xlane.xlu1 %845  ;;  %v624_v57 = vsel %vm623_vm12, %v1771_v53, -inf }
 0x2fa   : > { %625 = vmax.xlane.f32.xlu0 %v624_v57 }
 0x2fd   : > { %v830_v59 = vpop.xlane.xlu0 %829  ;;  %v666_v60 = vpop.xlane.xlu1 %665 }
 0x2fe   : > { %v693_v15 = vsel %vm610_vm7, %v666_v60, %v672_v22  ;;  %v851_v46 = vsel %vm610_vm7, %v824_v55, %v830_v59 }
 0x301   : > { %v836_v58 = vpop.xlane.xlu0 %835  ;;  %v741_v61 = vpop.xlane.xlu1 %740 }
 0x302   : > { %v853_v51 = vsel %vm613_vm8, %v851_v46, %v836_v58 }
 0x303   : > { %v855_v38 = vsel %vm616_vm11, %v853_v51, %v1763_v34 }
 0x305   : > { %v662_v62 = vpop.xlane.xlu0 %661  ;;  %v748_v63 = vpop.xlane.xlu1 %747 }
 0x306   : > { %v692_v2 = vsel %vm610_vm7, %v662_v62, %v669_v20  ;;  %v771_v3 = vsel %vm610_vm7, %v741_v61, %v748_v63 }
 0x307   : > { %v694_v4 = vsel %vm613_vm8, %v692_v2, %v675_v25  ;;  %v773_v5 = vsel %vm613_vm8, %v771_v3, %v754_v13 }
 0x308   : > { %v696_v0 = vsel %vm616_vm11, %v694_v4, %v681_v26  ;;  %v775_v7 = vsel %vm616_vm11, %v773_v5, %v760_v35 }
 0x309   : > { %v678_v8 = vpop.xlane.xlu0 %677  ;;  %v820_v9 = vpop.xlane.xlu1 %819  ;;  %v698_v10 = vsel %vm405_vm2, %v696_v0, %v688_v32  ;;  %v777_v12 = vsel %vm405_vm2, %v775_v7, %v767_v39 }
 0x30a   : > { %v1783_v14 = vmul.f32 0.17677669, %v698_v10  ;;  %v1788_v18 = vmul.f32 0.17677669, %v777_v12  ;;  %v695_v19 = vsel %vm613_vm8, %v693_v15, %v678_v8 }
 0x30c   : > { %v703_v16 = vsel %vm702_vm13, %v1783_v14, -inf  ;;  %v782_v13 = vsel %vm781_vm14, %v1788_v18, -inf }
 0x30d   : > { %v684_v11 = vpop.xlane.xlu0 %683  ;;  %704 = vmax.xlane.f32.xlu0 %v703_v16  ;;  %v827_v17 = vpop.xlane.xlu1 %826 }
 0x30e   : > { %v697_v20 = vsel %vm616_vm11, %v695_v19, %v684_v11  ;;  %v850_v25 = vsel %vm610_vm7, %v820_v9, %v827_v17 }
 0x30f   : > { %v699_v21 = vsel %vm405_vm2, %v697_v20, %v691_v54 }
 0x310   : > { %v1795_v22 = vmul.f32 0.17677669, %v699_v21 }
 0x311   : > { %v562_v26 = vpop.xlane.xlu0 %561  ;;  %783 = vmax.xlane.f32.xlu0 %v782_v13  ;;  %v833_v29 = vpop.xlane.xlu1 %832 }
 0x312   : > { %v852_v32 = vsel %vm613_vm8, %v850_v25, %v833_v29  ;;  %v707_v6 = vsel %vm706_vm15, %v1795_v22, -inf  ;;  %v612_v49 = vsel %vm610_vm7, %v1755_v24, %v562_v26 }
 0x313   : > { %v854_v35 = vsel %vm616_vm11, %v852_v32, %v1753_v23  ;;  %708 = vmax.xlane.f32.xlu1 %v707_v6  ;;  %v774_v23 = vsel %vm613_vm8, %v772_v40, %v1757_v27 }
 0x314   : > { %v856_v54 = vsel %vm405_vm2, %v854_v35, %v846_v56 }
 0x315   : > { %v579_v37 = vpop.xlane.xlu0 %578  ;;  %v1804_v39 = vmul.f32 0.17677669, %v856_v54  ;;  %v893_v57 = vpop.xlane.xlu1 %892 }
 0x316   : > { %v615_v59 = vsel %vm613_vm8, %v612_v49, %v579_v37 }
 0x317   : > { %v861_v43 = vsel %vm860_vm1, %v1804_v39, -inf }
 0x318   : > { %862 = vmax.xlane.f32.xlu0 %v861_v43 }
 0x319   : > { %v763_v52 = vpop.xlane.xlu0 %762  ;;  %v899_v34 = vpop.xlane.xlu1 %898 }
 0x31a   : > { %v776_v56 = vsel %vm616_vm11, %v774_v23, %v763_v52 }
 0x31b   : > { %v778_v60 = vsel %vm405_vm2, %v776_v56, %v1759_v31  ;;  %v857_v31 = vsel %vm405_vm2, %v855_v38, %v1765_v36 }
 0x31c   : > { %v780_v55 = vmul.f32 0.17677669, %v778_v60  ;;  %v859_v4 = vmul.f32 0.17677669, %v857_v31 }
 0x31d   : > { %v597_v58 = vpop.xlane.xlu0 %596  ;;  %v905_v7 = vpop.xlane.xlu1 %904 }
 0x31e   : > { %v618_v27 = vsel %vm616_vm11, %v615_v59, %v597_v58  ;;  %v786_v61 = vsel %vm785_vm3, %v780_v55, -inf  ;;  %v865_v8 = vsel %vm864_vm6, %v859_v4, -inf }
 0x31f   : > { %787 = vmax.xlane.f32.xlu1 %v786_v61  ;;  %v620_v62 = vsel %vm405_vm2, %v618_v27, %v1761_v33 }
 0x320   : > { %v622_v63 = vmul.f32 0.17677669, %v620_v62 }
 0x321   : > { %v896_v2 = vpop.xlane.xlu0 %895 }
 0x322   : > { %v906_v24 = vsel %vm610_vm7, %v893_v57, %v896_v2  ;;  %v628_v3 = vsel %vm627_vm4, %v622_v63, -inf  ;;  %vm2001_vm7 = vcmask 261120  }
 0x323   : > { %629 = vmax.xlane.f32.xlu1 %v628_v3  ;;  %v907_v0 = vsel %vm613_vm8, %v906_v24, %v899_v34  ;;  %vm974_vm8 = vcmask 199680  }
 0x325   : > { %v902_v5 = vpop.xlane.xlu0 %901 }
 0x326   : > { %v908_v33 = vsel %vm616_vm11, %v907_v0, %v902_v5  ;;  %v1471_v5 = vmov 1  }
 0x327   : > { %866 = vmax.xlane.f32.xlu1 %v865_v8  ;;  %v909_v36 = vsel %vm405_vm2, %v908_v33, %v905_v7  ;;  %1393 = vset.pattern.permute.xlu0 %v1471_v5  ;;  %vm966_vm2 = vcmask 121856  }
 0x328   : > { %v910_v9 = vmul.f32 0.17677669, %v909_v36 }
 0x32a   : > { %v912_v10 = vsel %vm911_vm5, %v910_v9, -inf }
 0x32b   : > { %913 = vmax.xlane.f32.xlu0 %v912_v10 }
 0x387   : > { %v626_v12 = vpop.xlane.xlu0 %625 }
 0x388   : > { %v631_v15 = vsub.f32 %v1771_v53, %v626_v12 }
 0x38a   : > { %v633_v16 = vmul.f32 1.442695, %v631_v15 }
 0x38c   : > { %1404 = vpow2.f32 %v633_v16 }
 0x396   : > { %v1835_v19 = vpop.eup %1404 }
 0x397   : > { %v637_v11 = vsel %vm623_vm12, %v1835_v19, 0.0 }
 0x398   : > { %638 = vadd.xlane.f32.xlu1 %v637_v11 }
 0x39a   : > { %v705_v17 = vpop.xlane.xlu0 %704 }
 0x39b   : > { %v710_v20 = vsub.f32 %v1783_v14, %v705_v17 }
 0x39d   : > { %v712_v21 = vmul.f32 1.442695, %v710_v20 }
 0x39e   : > { %v784_v13 = vpop.xlane.xlu0 %783 }
 0x39f   : > { %1406 = vpow2.f32 %v712_v21  ;;  %v789_v25 = vsub.f32 %v1788_v18, %v784_v13 }
 0x3a0   : > { %v709_v26 = vpop.xlane.xlu1 %708 }
 0x3a1   : > { %v791_v29 = vmul.f32 1.442695, %v789_v25  ;;  %v711_v53 = vsub.f32 %v1795_v22, %v709_v26 }
 0x3a3   : > { %1408 = vpow2.f32 %v791_v29  ;;  %v714_v32 = vmul.f32 1.442695, %v711_v53 }
 0x3a5   : > { %1410 = vpow2.f32 %v714_v32  ;;  %v863_v6 = vpop.xlane.xlu0 %862 }
 0x3a6   : > { %v868_v35 = vsub.f32 %v1804_v39, %v863_v6 }
 0x3a8   : > { %v870_v54 = vmul.f32 1.442695, %v868_v35 }
 0x3a9   : > { %v1843_v37 = vpop.eup %1406 }
 0x3aa   : > { %1412 = vpow2.f32 %v870_v54  ;;  %v716_v14 = vsel %vm702_vm13, %v1843_v37, 0.0 }
 0x3ab   : > { %717 = vadd.xlane.f32.xlu1 %v716_v14 }
 0x3ac   : > { %v788_v40 = vpop.xlane.xlu1 %787 }
 0x3ad   : > { %v1847_v18 = vpop.eup %1408  ;;  %v790_v43 = vsub.f32 %v780_v55, %v788_v40 }
 0x3ae   : > { %v795_v22 = vsel %vm781_vm14, %v1847_v18, 0.0 }
 0x3af   : > { %v1851_v46 = vpop.eup %1410  ;;  %v793_v51 = vmul.f32 1.442695, %v790_v43  ;;  %796 = vadd.xlane.f32.xlu1 %v795_v22 }
 0x3b0   : > { %v630_v39 = vpop.xlane.xlu1 %629  ;;  %v719_v23 = vsel %vm706_vm15, %v1851_v46, 0.0 }
 0x3b1   : > { %1414 = vpow2.f32 %v793_v51  ;;  %v632_v52 = vsub.f32 %v622_v63, %v630_v39  ;;  %720 = vadd.xlane.f32.xlu0 %v719_v23 }
 0x3b3   : > { %v635_v57 = vmul.f32 1.442695, %v632_v52 }
 0x3b4   : > { %v1413_v56 = vpop.eup %1412  ;;  %v867_v60 = vpop.xlane.xlu1 %866 }
 0x3b5   : > { %1416 = vpow2.f32 %v635_v57  ;;  %v869_v38 = vsub.f32 %v859_v4, %v867_v60  ;;  %v874_v49 = vsel %vm860_vm1, %v1413_v56, 0.0  ;;  %v1470_v4 = vmov 2  }
 0x3b6   : > { %875 = vadd.xlane.f32.xlu1 %v874_v49  ;;  %v1472_v60 = vmov 3  }
 0x3b7   : > { %v872_v55 = vmul.f32 1.442695, %v869_v38  ;;  %1394 = vset.pattern.permute.xlu1 %v1470_v4  ;;  %v1473_v38 = vmov 0  }
 0x3b8   : > { %v914_v59 = vpop.xlane.xlu0 %913 }
 0x3b9   : > { %1418 = vpow2.f32 %v872_v55  ;;  %v915_v58 = vsub.f32 %v910_v9, %v914_v59 }
 0x3bb   : > { %v1856_v27 = vpop.eup %1414  ;;  %v916_v61 = vmul.f32 1.442695, %v915_v58  ;;  %v1474_v58 = vmov 4  }
 0x3bc   : > { %v798_v62 = vsel %vm785_vm3, %v1856_v27, 0.0 }
 0x3bd   : > { %1420 = vpow2.f32 %v916_v61  ;;  %799 = vadd.xlane.f32.xlu0 %v798_v62 }
 0x3bf   : > { %v1417_v31 = vpop.eup %1416 }
 0x3c0   : > { %v640_v34 = vsel %vm627_vm4, %v1417_v31, 0.0 }
 0x3c1   : > { %641 = vadd.xlane.f32.xlu0 %v640_v34 }
 0x3c3   : > { %v1419_v63 = vpop.eup %1418 }
 0x3c4   : > { %v877_v2 = vsel %vm864_vm6, %v1419_v63, 0.0 }
 0x3c5   : > { %878 = vadd.xlane.f32.xlu0 %v877_v2 }
 0x3c7   : > { %v1421_v24 = vpop.eup %1420 }
 0x3c8   : > { %v918_v3 = vsel %vm911_vm5, %v1421_v24, 0.0 }
 0x3c9   : > { %919 = vadd.xlane.f32.xlu1 %v918_v3 }
 0x3da   : > { %1011 = vrot.lane.b32.xlu1 %v1598_v41, %s1469_s12 }
 0x3db   : > { %1013 = vrot.lane.b32.xlu0 %v1615_v45, %s1469_s12 }
 0x3de   : > { %1037 = vrot.lane.b32.xlu1 %v1604_v42, %s1469_s12 }
 0x425   : > { %v639_v0 = vpop.xlane.xlu1 %638 }
 0x438   : > { %v718_v7 = vpop.xlane.xlu1 %717 }
 0x439   : > { %1422 = vrcp.f32 %v718_v7 }
 0x43c   : > { %v797_v8 = vpop.xlane.xlu1 %796 }
 0x43d   : > { %1424 = vrcp.f32 %v797_v8 }
 0x43e   : > { %v721_v33 = vpop.xlane.xlu0 %720 }
 0x443   : > { %v876_v9 = vpop.xlane.xlu1 %875  ;;  %v1423_v45 = vpop.eup %1422 }
 0x444   : > { %1426 = vrcp.f32 %v876_v9  ;;  %v723_v15 = vmul.f32 %v1423_v45, %v1843_v37 }
 0x445   : > { %1428 = vrcp.f32 %v639_v0 }
 0x446   : > { %1430 = vrcp.f32 %v721_v33  ;;  %v1873_v20 = vrot.slane %v723_v15, 7  ;;  %v1106_v15 = vld [vmem:[%s1996_s5 + $0x8] sm:$0xff] }
 0x447   : > { %v1425_v12 = vpop.eup %1424 }
 0x448   : > { %v802_v11 = vmul.f32 %v1425_v12, %v1847_v18  ;;  %v1105_v12 = vld [vmem:[%s1996_s5] sm:$0xff] }
 0x44a   : > { %v800_v36 = vpop.xlane.xlu0 %799  ;;  %v1878_v25 = vrot.slane %v802_v11, 6  ;;  %v1109_v11 = vpack.c.bf16 %v1106_v15, %v1105_v12 }
 0x44c   : > { %1349 = vmatpush3.bf16.msra.mxu0 %v1109_v11 }
 0x44d   : > { %1350 = vmatprep.subr.bf16.mxu0 %v1466_v1 }
 0x44e   : > { %v642_v41 = vpop.xlane.xlu0 %641  ;;  %v1427_v16 = vpop.eup %1426 }
 0x44f   : > { %v1429_v17 = vpop.eup %1428  ;;  %v881_v21 = vmul.f32 %v1427_v16, %v1413_v56  ;;  %v1107_v16 = vld [vmem:[%s1996_s5 + $0x10] sm:$0xff] }
 0x450   : > { %v1876_v13 = vmul.f32 %v1429_v17, %v1835_v19  ;;  %v1431_v26 = vpop.eup %1430  ;;  %v1108_v17 = vld [vmem:[%s1996_s5 + $0x18] sm:$0xff] }
 0x451   : > { %v1882_v53 = vrot.slane %v881_v21, 5  ;;  %v725_v35 = vmul.f32 %v1431_v26, %v1851_v46 }
 0x452   : > { %v879_v42 = vpop.xlane.xlu0 %878  ;;  %v978_v29 = vadd.f32 %v1873_v20, %v1876_v13 }
 0x453   : > { %v926_v43 = vrot.slane %v725_v35, 7 }
 0x454   : > { %v982_v37 = vadd.f32 %v978_v29, %v1878_v25 }
 0x455   : > { %v1895_v52 = vsel %vm545_vm9, %v1873_v20, %v926_v43  ;;  %vm969_vm9 = vcmask 162816  }
 0x456   : > { %v920_v10 = vpop.xlane.xlu1 %919  ;;  %v986_v19 = vadd.f32 %v982_v37, %v1882_v53  ;;  %v1014_v61 = vpop.permute.xlu0 %1013 }
 0x457   : > { %1432 = vrcp.f32 %v920_v10 }
 0x458   : > { %1434 = vrcp.f32 %v800_v36 }
 0x459   : > { %1436 = vrcp.f32 %v879_v42 }
 0x45a   : > { %1438 = vrcp.f32 %v642_v41 }
 0x461   : > { %v1433_v32 = vpop.eup %1432 }
 0x462   : > { %v1435_v6 = vpop.eup %1434  ;;  %v922_v54 = vmul.f32 %v1433_v32, %v1421_v24 }
 0x463   : > { %v1437_v14 = vpop.eup %1436  ;;  %v804_v22 = vmul.f32 %v1435_v6, %v1856_v27 }
 0x464   : > { %v1439_v40 = vpop.eup %1438  ;;  %v1886_v18 = vrot.slane %v922_v54, 4  ;;  %v883_v51 = vmul.f32 %v1437_v14, %v1419_v63 }
 0x465   : > { %v1891_v23 = vmul.f32 %v1439_v40, %v1417_v31  ;;  %v937_v46 = vrot.slane %v804_v22, 6 }
 0x466   : > { %v989_v39 = vadd.f32 %v986_v19, %v1886_v18  ;;  %v948_v57 = vrot.slane %v883_v51, 5 }
 0x467   : > { %v979_v56 = vadd.f32 %v1895_v52, %v1891_v23  ;;  %v1903_v49 = vsel %vm409_vm0, %v1878_v25, %v937_v46  ;;  %vm963_vm0 = vcmask 80896  }
 0x468   : > { %1030 = vperm.xlu1 %1394, %v989_v39   ;;  %1004 = vperm.xlu0 %1393, %v989_v39   ;;  %v1907_v55 = vsel %vm580_vm10, %v1882_v53, %v948_v57  ;;  %vm972_vm10 = vcmask 203780  }
 0x469   : > { %v983_v59 = vadd.f32 %v979_v56, %v1903_v49 }
 0x46c   : > { %1395 = vset.pattern.permute.xlu1 %v1472_v60  ;;  %1039 = vrot.lane.b32.xlu0 %v1627_v48, %s1469_s12  ;;  %v987_v48 = vadd.f32 %v983_v59, %v1907_v55 }
 0x46d   : > { %1056 = vperm.xlu1 %1395, %v989_v39   ;;  %1401 = vset.pattern.permute.xlu0 %v1473_v38 }
 0x46e   : > { %v990_v27 = vadd.f32 %v987_v48, %v1886_v18 }
 0x470   : > { %1065 = vrot.lane.b32.xlu0 %v1638_v50, %s1469_s12  ;;  %v1012_v50 = vpop.permute.xlu1 %1011 }
 0x471   : > { %1396 = vset.pattern.permute.xlu1 %v1474_v58 }
 0x472   : > { %1082 = vperm.xlu1 %1396, %v989_v39  }
 0x474   : > { %993 = vperm.xlu0 %1401, %v989_v39   ;;  %v1038_v62 = vpop.permute.xlu1 %1037 }
 0x476   : > { %1397 = vset.pattern.permute.xlu1 %v1471_v5 }
 0x477   : > { %1008 = vperm.xlu1 %1397, %v990_v27  }
 0x478   : > { %1403 = vset.pattern.permute.xlu0 %v1474_v58 }
 0x47b   : > { %1398 = vset.pattern.permute.xlu1 %v1470_v4 }
 0x47c   : > { %1034 = vperm.xlu1 %1398, %v990_v27  }
 0x480   : > { %1399 = vset.pattern.permute.xlu1 %v1472_v60 }
 0x481   : > { %1060 = vperm.xlu1 %1399, %v990_v27  }
 0x485   : > { %1400 = vset.pattern.permute.xlu1 %v1474_v58 }
 0x486   : > { %1086 = vperm.xlu1 %1400, %v990_v27  }
 0x48a   : > { %1063 = vrot.lane.b32.xlu1 %v1611_v44, %s1469_s12 }
 0x48b   : > { %1402 = vset.pattern.permute.xlu1 %v1473_v38 }
 0x48e   : > { %1089 = vrot.lane.b32.xlu1 %v1623_v47, %s1469_s12 }
 0x492   : > { %998 = vperm.xlu1 %1402, %v990_v27  }
 0x4e7   : > { %v1005_v31 = vpop.permute.xlu0 %1004  ;;  %v1031_v34 = vpop.permute.xlu1 %1030 }
 0x4e8   : > { %v1017_v63 = vmul.f32 %v1012_v50, %v1005_v31  ;;  %v1043_v2 = vmul.f32 %v1038_v62, %v1031_v34 }
 0x4ea   : > { %1021 = vrot.lane.b32.xlu1 %v1017_v63, %s1469_s12 }
 0x4eb   : > { %v1040_v5 = vpop.permute.xlu0 %1039 }
 0x4ec   : > { %v1057_v24 = vpop.permute.xlu1 %1056 }
 0x4ee   : > { %1047 = vrot.lane.b32.xlu1 %v1043_v2, %s1469_s12 }
 0x4ef   : > { %v1066_v7 = vpop.permute.xlu0 %1065 }
 0x4f1   : > { %v1083_v3 = vpop.permute.xlu1 %1082 }
 0x4f3   : > { %v994_v21 = vpop.permute.xlu0 %993 }
 0x4f6   : > { %v1009_v4 = vpop.permute.xlu1 %1008 }
 0x4f7   : > { %v1018_v44 = vmul.f32 %v1014_v61, %v1009_v4 }
 0x4f9   : > { %1023 = vrot.lane.b32.xlu0 %v1018_v44, %s1469_s12 }
 0x4fb   : > { %v1035_v47 = vpop.permute.xlu1 %1034 }
 0x4fc   : > { %v1044_v0 = vmul.f32 %v1040_v5, %v1035_v47 }
 0x4fe   : > { %1049 = vrot.lane.b32.xlu0 %v1044_v0, %s1469_s12 }
 0x500   : > { %v1061_v33 = vpop.permute.xlu1 %1060 }
 0x501   : > { %v1070_v8 = vmul.f32 %v1066_v7, %v1061_v33 }
 0x503   : > { %1075 = vrot.lane.b32.xlu0 %v1070_v8, %s1469_s12 }
 0x505   : > { %v1087_v36 = vpop.permute.xlu1 %1086 }
 0x509   : > { %v1064_v9 = vpop.permute.xlu1 %1063 }
 0x50a   : > { %v1069_v41 = vmul.f32 %v1064_v9, %v1057_v24 }
 0x50c   : > { %1073 = vrot.lane.b32.xlu1 %v1069_v41, %s1469_s12 }
 0x50d   : > { %v1090_v45 = vpop.permute.xlu1 %1089 }
 0x50e   : > { %v1092_v42 = vmul.f32 %v1090_v45, %v1083_v3  ;;  %v1093_v10 = vmul.f32 %v1090_v45, %v1087_v36 }
 0x510   : > { %1098 = vrot.lane.b32.xlu0 %v1093_v10, %s1469_s12  ;;  %1096 = vrot.lane.b32.xlu1 %v1092_v42, %s1469_s12 }
 0x511   : > { %v999_v26 = vpop.permute.xlu1 %998 }
 0x512   : > { %v1002_v54 = vmul.f32 %v999_v26, %v1586_v30 }
 0x514   : > { %928 = vrot.lane.b32.xlu0 %v1873_v20, %s1475_s13  ;;  %v1110_v20 = vpack.c.bf16 %v1108_v17, %v1107_v16 }
 0x516   : > { %1351 = vmatpush3.bf16.msra.mxu0 %v1110_v20 }
 0x518   : > { %939 = vrot.lane.b32.xlu0 %v1878_v25, %s1476_s22  ;;  %v1001_v25 = vmul.f32 %v994_v21, %v1582_v28 }
 0x51c   : > { %950 = vrot.lane.b32.xlu0 %v1882_v53, %s1477_s23 }
 0x520   : > { %958 = vrot.lane.b32.xlu0 %v1886_v18, %s1478_s24 }
 0x55c   : > { %v1022_v32 = vpop.permute.xlu1 %1021 }
 0x55d   : > { %v1027_v37 = vadd.f32 %v1022_v32, %v1001_v25 }
 0x560   : > { %v1048_v35 = vpop.permute.xlu1 %1047 }
 0x561   : > { %v1053_v19 = vadd.f32 %v1048_v35, %v1027_v37 }
 0x56b   : > { %v1024_v29 = vpop.permute.xlu0 %1023 }
 0x56c   : > { %v1028_v1 = vadd.f32 %v1024_v29, %v1002_v54 }
 0x570   : > { %v1050_v6 = vpop.permute.xlu0 %1049 }
 0x571   : > { %v1054_v53 = vadd.f32 %v1050_v6, %v1028_v1 }
 0x575   : > { %v1076_v14 = vpop.permute.xlu0 %1075 }
 0x576   : > { %v1080_v43 = vadd.f32 %v1076_v14, %v1054_v53 }
 0x57e   : > { %v1074_v40 = vpop.permute.xlu1 %1073 }
 0x57f   : > { %v1079_v22 = vadd.f32 %v1074_v40, %v1053_v19 }
 0x582   : > { %v1099_v18 = vpop.permute.xlu0 %1098  ;;  %v1097_v51 = vpop.permute.xlu1 %1096 }
 0x583   : > { %v1103_v39 = vadd.f32 %v1099_v18, %v1080_v43  ;;  %v1102_v46 = vadd.f32 %v1097_v51, %v1079_v22 }
 0x585   : > { %v1104_v57 = vpack.c.bf16 %v1103_v39, %v1102_v46 }
 0x586   : > { %v929_v56 = vpop.permute.xlu0 %928 }
 0x587   : > { %v1119_v60 = vrot.slane %v1104_v57, 2  ;;  %v961_v38 = vsel %vm911_vm5, %v1876_v13, %v929_v56 }
 0x589   : > { %1120 = vrot.lane.b32.xlu1 %v1119_v60, %s1469_s12 }
 0x58a   : > { %v940_v28 = vpop.permute.xlu0 %939 }
 0x58b   : > { %v964_v59 = vsel %vm963_vm0, %v961_v38, %v940_v28 }
 0x58d   : > { %930 = vrot.lane.b32.xlu1 %v1895_v52, %s1475_s13 }
 0x58e   : > { %v951_v30 = vpop.permute.xlu0 %950 }
 0x58f   : > { %v967_v52 = vsel %vm966_vm2, %v964_v59, %v951_v30 }
 0x591   : > { %941 = vrot.lane.b32.xlu1 %v1903_v49, %s1476_s22 }
 0x592   : > { %v959_v58 = vpop.permute.xlu0 %958 }
 0x593   : > { %v970_v48 = vsel %vm969_vm9, %v967_v52, %v959_v58 }
 0x594   : > { %973 = vst.msk [vmem:[%s391_s10 - $0x4] sm:$0xf0] %vm972_vm10, %v970_v48 }
 0x595   : > { %952 = vrot.lane.b32.xlu1 %v1907_v55, %s1477_s23  ;;  %v1318_v55 = vld [vmem:[%s1997_s6] ss:$0 sm:$0xff] }
 0x5fb   : > { %v1121_v13 = vpop.permute.xlu1 %1120 }
 0x5fc   : > { %1353 = vmatmul.mubr.msk.bf16.vlgmr.msra.gmra.mrb[4].mxu0 %vm2001_vm7, %v1121_v13 }
 0x5ff   : > { %v931_v27 = vpop.permute.xlu1 %930 }
 0x600   : > { %v962_v50 = vsel %vm911_vm5, %v1891_v23, %v931_v27  ;;  %vm1166_vm5 = vcmask 48128  }
 0x603   : > { %v942_v49 = vpop.permute.xlu1 %941 }
 0x604   : > { %v965_v61 = vsel %vm963_vm0, %v962_v50, %v942_v49 }
 0x607   : > { %v953_v62 = vpop.permute.xlu1 %952 }
 0x608   : > { %v968_v31 = vsel %vm966_vm2, %v965_v61, %v953_v62 }
 0x609   : > { %v971_v34 = vsel %vm969_vm9, %v968_v31, %v959_v58 }
 0x60a   : > { %975 = vst.msk [vmem:[%s391_s10 + $0x4] sm:$0xf] %vm974_vm8, %v971_v34 }
 0x6cf   : > { %v1159_v63 = vpop.f32.mrb[4].mxu0 }
 0x6d0   : > { %v1160_v2 = vadd.f32 %v1318_v55, %v1159_v63  ;;  %v1354_v24 = vpop.f32.mrb[5].mxu0 }
 0x6d1   : > { %v1162_v3 = vpop.f32.mrb[6].mxu0 }
 0x6d2   : > { %1440 = vtanh.f32 %v1160_v2  ;;  %v1355_v4 = vpop.f32.mrb[7].mxu0 }
 0x6dc   : > { %v1441_v23 = vpop.eup %1440 }
 0x6dd   : > { %1167 = vst.msk [vmem:[%s384_s15] sm:$0xff] %vm1166_vm5, %v1441_v23 }
 0x6de PF: > { %s19_s29 = sadd.s32 1, %s1464_s29   ;;  %s2002_s27 = smov %s1460_s28 }
 0x6df   : > { %p16_p5 = scmp.ge.s32.totalorder %s19_s29, 4   ;;  %s2003_s28 = smov %s2005_s30 }
 0x6e1   :  { %18 = sbr.rel (!%p16_p5) target bundleno = 2 (0x2), region = 93 }

</bundles_post_ra>
